<compile_context>
chip_gen: v7x
topology: tpu7x:2x2x1
jax: 0.10.0
libtpu: 0.0.40
codegen_flags: <defaults>
</compile_context>

<pallas_src>
import functools
import math

import jax
import jax.numpy as jnp
from jax import lax
from jax.experimental import pallas as pl
from jax.experimental.pallas import tpu as pltpu


ACT_DTYPE = jnp.bfloat16      # activations / matmul operands
PARAM_DTYPE = jnp.bfloat16    # matmul weights (biases / LN params stay f32)
VMEM_LIMIT = 48 * 1024 * 1024  # explicit scoped-VMEM budget (headroom under v7x 64 MiB)


def _pick_tile(dim, preferred):
    """Largest preferred tile that evenly divides `dim`; else the full dim."""
    for t in preferred:
        if t <= dim and dim % t == 0:
            return t
    return dim


# ----------------------------- Pallas kernels -----------------------------

def _add_pe_kernel(x_ref, pe_ref, o_ref):
    # x block: (S, D) f32, pe block: (S, D) f32 (resident across the batch grid)
    o_ref[...] = (x_ref[...] + pe_ref[...]).astype(o_ref.dtype)


def _linear_kernel(x_ref, w_ref, b_ref, o_ref, acc_ref):
    # Tiled matmul + bias.  grid = (M/tm, N/tn, K/tk), K axis last ("arbitrary").
    k = pl.program_id(2)

    @pl.when(k == 0)
    def _init():
        acc_ref[...] = jnp.zeros_like(acc_ref)

    acc_ref[...] += jnp.dot(x_ref[...], w_ref[...],
                            preferred_element_type=jnp.float32)

    @pl.when(k == pl.num_programs(2) - 1)
    def _fin():
        o_ref[...] = (acc_ref[...] + b_ref[...]).astype(o_ref.dtype)


def _linear_res_ln_kernel(x_ref, w_ref, b_ref, res_ref, g_ref, beta_ref,
                          o_ref, acc_ref, *, eps):
    # Tiled matmul + bias, then fused residual add + LayerNorm epilogue.
    # grid = (M/tm, K/tk); N = full dim_embed so LN can see the whole row.
    k = pl.program_id(1)

    @pl.when(k == 0)
    def _init():
        acc_ref[...] = jnp.zeros_like(acc_ref)

    acc_ref[...] += jnp.dot(x_ref[...], w_ref[...],
                            preferred_element_type=jnp.float32)

    @pl.when(k == pl.num_programs(1) - 1)
    def _fin():
        y = acc_ref[...] + b_ref[...] + res_ref[...].astype(jnp.float32)
        mu = jnp.mean(y, axis=-1, keepdims=True)
        var = jnp.mean(jnp.square(y - mu), axis=-1, keepdims=True)
        yn = (y - mu) * lax.rsqrt(var + eps)
        o_ref[...] = (yn * g_ref[...] + beta_ref[...]).astype(o_ref.dtype)


def _ffn_res_ln_kernel(x_ref, w1_ref, b1_ref, w2_ref, b2_ref, g_ref, beta_ref,
                       o_ref, acc_ref, *, eps):
    # Fused FFN: relu(x@W1+b1)@W2+b2, tiling dim_ffn (grid axis 1, "arbitrary"),
    # accumulating the second matmul over dim_ffn tiles; epilogue fuses the
    # residual add (residual == x) + LayerNorm.  x tile stays VMEM-resident.
    f = pl.program_id(1)

    @pl.when(f == 0)
    def _init():
        acc_ref[...] = jnp.zeros_like(acc_ref)

    h = jnp.dot(x_ref[...], w1_ref[...], preferred_element_type=jnp.float32)
    h = jnp.maximum(h + b1_ref[...], 0.0)
    acc_ref[...] += jnp.dot(h.astype(w2_ref.dtype), w2_ref[...],
                            preferred_element_type=jnp.float32)

    @pl.when(f == pl.num_programs(1) - 1)
    def _fin():
        y = acc_ref[...] + b2_ref[...] + x_ref[...].astype(jnp.float32)
        mu = jnp.mean(y, axis=-1, keepdims=True)
        var = jnp.mean(jnp.square(y - mu), axis=-1, keepdims=True)
        yn = (y - mu) * lax.rsqrt(var + eps)
        o_ref[...] = (yn * g_ref[...] + beta_ref[...]).astype(o_ref.dtype)


def _attn_kernel(q_ref, kv_ref, o_ref, *, num_heads, dh, q_off, k_off, v_off,
                 scale, causal, q_tile):
    # q block: (tq, Wq), kv block: (Skv, Wkv).  Heads are unrolled in-kernel
    # (static lane slices) — no plain-JAX (B,H,S,Dh) transposes around the call.
    q_all = q_ref[...]
    kv_all = kv_ref[...]
    tq = q_all.shape[0]
    skv = kv_all.shape[0]

    if causal:
        q_pos = lax.broadcasted_iota(jnp.int32, (tq, skv), 0) + pl.program_id(1) * q_tile
        k_pos = lax.broadcasted_iota(jnp.int32, (tq, skv), 1)
        # mask in f32 (never downcast the mask/scores)
        mask_bias = jnp.where(k_pos <= q_pos, 0.0, -1e30).astype(jnp.float32)

    outs = []
    for h in range(num_heads):
        qh = q_all[:, q_off + h * dh: q_off + (h + 1) * dh]
        kh = kv_all[:, k_off + h * dh: k_off + (h + 1) * dh]
        vh = kv_all[:, v_off + h * dh: v_off + (h + 1) * dh]
        # NT contraction (contract last axes) — no explicit k.T transpose.
        s = lax.dot_general(qh, kh, (((1,), (1,)), ((), ())),
                            preferred_element_type=jnp.float32) * scale
        if causal:
            s = s + mask_bias
        m = jnp.max(s, axis=-1, keepdims=True)
        p = jnp.exp(s - m)
        l = jnp.sum(p, axis=-1, keepdims=True)
        p = p * pl.reciprocal(l, approx=True)
        outs.append(jnp.dot(p.astype(vh.dtype), vh,
                            preferred_element_type=jnp.float32))
    # single lane-contiguous store of all heads
    o_ref[...] = jnp.concatenate(outs, axis=-1).astype(o_ref.dtype)


# ----------------------------- Pallas wrappers -----------------------------

def add_positional_encoding(x_flat, pe, B, S, D):
    return pl.pallas_call(
        _add_pe_kernel,
        out_shape=jax.ShapeDtypeStruct((B * S, D), ACT_DTYPE),
        grid=(B,),
        in_specs=[
            pl.BlockSpec((S, D), lambda b: (b, 0)),
            pl.BlockSpec((S, D), lambda b: (0, 0)),   # pe stays VMEM-resident
        ],
        out_specs=pl.BlockSpec((S, D), lambda b: (b, 0)),
        compiler_params=pltpu.CompilerParams(
            dimension_semantics=("parallel",),
            vmem_limit_bytes=VMEM_LIMIT,
        ),
    )(x_flat, pe)


def linear(x2d, w, b):
    M, K = x2d.shape
    N = w.shape[1]
    tm = _pick_tile(M, (512, 256, 128))
    tn = _pick_tile(N, (512, 256))      # 256-multiples to feed v6e/v7x MXU
    tk = _pick_tile(K, (512, 256))
    grid = (M // tm, N // tn, K // tk)
    return pl.pallas_call(
        _linear_kernel,
        out_shape=jax.ShapeDtypeStruct((M, N), ACT_DTYPE),
        grid_spec=pltpu.PrefetchScalarGridSpec(
            num_scalar_prefetch=0,
            grid=grid,
            in_specs=[
                pl.BlockSpec((tm, tk), lambda i, j, k: (i, k)),
                pl.BlockSpec((tk, tn), lambda i, j, k: (k, j)),
                pl.BlockSpec((1, tn), lambda i, j, k: (0, j)),
            ],
            out_specs=pl.BlockSpec((tm, tn), lambda i, j, k: (i, j)),
            scratch_shapes=[pltpu.VMEM((tm, tn), jnp.float32)],
        ),
        compiler_params=pltpu.CompilerParams(
            dimension_semantics=("parallel", "parallel", "arbitrary"),
            vmem_limit_bytes=VMEM_LIMIT,
        ),
    )(x2d, w, b.reshape(1, N))


def linear_res_ln(x2d, w, b, res2d, gamma, beta, eps=1e-5):
    M, K = x2d.shape
    N = w.shape[1]                       # N == dim_embed (LN over full row)
    tm = _pick_tile(M, (512, 256, 128))
    tk = _pick_tile(K, (512, 256))
    grid = (M // tm, K // tk)
    kernel = functools.partial(_linear_res_ln_kernel, eps=eps)
    return pl.pallas_call(
        kernel,
        out_shape=jax.ShapeDtypeStruct((M, N), ACT_DTYPE),
        grid_spec=pltpu.PrefetchScalarGridSpec(
            num_scalar_prefetch=0,
            grid=grid,
            in_specs=[
                pl.BlockSpec((tm, tk), lambda i, k: (i, k)),
                pl.BlockSpec((tk, N), lambda i, k: (k, 0)),
                pl.BlockSpec((1, N), lambda i, k: (0, 0)),
                pl.BlockSpec((tm, N), lambda i, k: (i, 0)),
                pl.BlockSpec((1, N), lambda i, k: (0, 0)),
                pl.BlockSpec((1, N), lambda i, k: (0, 0)),
            ],
            out_specs=pl.BlockSpec((tm, N), lambda i, k: (i, 0)),
            scratch_shapes=[pltpu.VMEM((tm, N), jnp.float32)],
        ),
        compiler_params=pltpu.CompilerParams(
            dimension_semantics=("parallel", "arbitrary"),
            vmem_limit_bytes=VMEM_LIMIT,
        ),
    )(x2d, w, b.reshape(1, N), res2d, gamma.reshape(1, N), beta.reshape(1, N))


def ffn_res_ln(x2d, ffn_p, gamma, beta, eps=1e-5):
    M, D = x2d.shape
    F = ffn_p["w1"].shape[1]
    tm = _pick_tile(M, (512, 256, 128))
    tf = _pick_tile(F, (512, 256))       # tile dim_ffn so W1/W2 tiles fit v7x VMEM
    grid = (M // tm, F // tf)
    kernel = functools.partial(_ffn_res_ln_kernel, eps=eps)
    return pl.pallas_call(
        kernel,
        out_shape=jax.ShapeDtypeStruct((M, D), ACT_DTYPE),
        grid_spec=pltpu.PrefetchScalarGridSpec(
            num_scalar_prefetch=0,
            grid=grid,
            in_specs=[
                pl.BlockSpec((tm, D), lambda i, f: (i, 0)),   # x (resident over f)
                pl.BlockSpec((D, tf), lambda i, f: (0, f)),   # W1 tile
                pl.BlockSpec((1, tf), lambda i, f: (0, f)),   # b1 tile
                pl.BlockSpec((tf, D), lambda i, f: (f, 0)),   # W2 tile
                pl.BlockSpec((1, D), lambda i, f: (0, 0)),    # b2
                pl.BlockSpec((1, D), lambda i, f: (0, 0)),    # gamma
                pl.BlockSpec((1, D), lambda i, f: (0, 0)),    # beta
            ],
            out_specs=pl.BlockSpec((tm, D), lambda i, f: (i, 0)),
            scratch_shapes=[pltpu.VMEM((tm, D), jnp.float32)],
        ),
        compiler_params=pltpu.CompilerParams(
            dimension_semantics=("parallel", "arbitrary"),
            vmem_limit_bytes=VMEM_LIMIT,
        ),
    )(x2d, ffn_p["w1"], ffn_p["b1"].reshape(1, F), ffn_p["w2"],
      ffn_p["b2"].reshape(1, D), gamma.reshape(1, D), beta.reshape(1, D))


def attention(q_src, kv_src, *, num_heads, dh, q_off, k_off, v_off, causal, out_dim):
    B, Sq, Wq = q_src.shape
    _, Skv, Wkv = kv_src.shape
    tq = _pick_tile(Sq, (256, 128))
    kernel = functools.partial(
        _attn_kernel, num_heads=num_heads, dh=dh, q_off=q_off, k_off=k_off,
        v_off=v_off, scale=1.0 / math.sqrt(dh), causal=causal, q_tile=tq)
    return pl.pallas_call(
        kernel,
        out_shape=jax.ShapeDtypeStruct((B, Sq, out_dim), ACT_DTYPE),
        grid=(B, Sq // tq),
        in_specs=[
            pl.BlockSpec((None, tq, Wq), lambda b, qi: (b, qi, 0)),
            pl.BlockSpec((None, Skv, Wkv), lambda b, qi: (b, 0, 0)),  # KV resident over qi
        ],
        out_specs=pl.BlockSpec((None, tq, out_dim), lambda b, qi: (b, qi, 0)),
        compiler_params=pltpu.CompilerParams(
            dimension_semantics=("parallel", "parallel"),
            vmem_limit_bytes=VMEM_LIMIT,
        ),
    )(q_src, kv_src)


# ----------------------------- Model glue -----------------------------

def encoder_layer(x_flat, p, B, S, D, H, Dh):
    M = B * S
    qkv = linear(x_flat, p["wqkv"], p["bqkv"])                 # fused QKV (M, 3D)
    qkv3 = qkv.reshape(B, S, 3 * D)
    sa = attention(qkv3, qkv3, num_heads=H, dh=Dh,
                   q_off=0, k_off=D, v_off=2 * D, causal=False, out_dim=D)
    x_flat = linear_res_ln(sa.reshape(M, D), p["wo"], p["bo"], x_flat, *p["ln1"])
    x_flat = ffn_res_ln(x_flat, p["ffn"], *p["ln2"])
    return x_flat


def decoder_layer(x_flat, mem_flat, p, B, Sq, Skv, D, H, Dh):
    M = B * Sq
    qkv = linear(x_flat, p["wqkv"], p["bqkv"])                 # fused QKV (M, 3D)
    qkv3 = qkv.reshape(B, Sq, 3 * D)
    sa = attention(qkv3, qkv3, num_heads=H, dh=Dh,
                   q_off=0, k_off=D, v_off=2 * D, causal=True, out_dim=D)
    x_flat = linear_res_ln(sa.reshape(M, D), p["wo_sa"], p["bo_sa"], x_flat, *p["ln1"])

    q = linear(x_flat, p["wq_ca"], p["bq_ca"])                 # (M, D)
    kv = linear(mem_flat, p["wkv_ca"], p["bkv_ca"])            # fused KV (B*Skv, 2D)
    ca = attention(q.reshape(B, Sq, D), kv.reshape(B, Skv, 2 * D),
                   num_heads=H, dh=Dh, q_off=0, k_off=0, v_off=D,
                   causal=False, out_dim=D)
    x_flat = linear_res_ln(ca.reshape(M, D), p["wo_ca"], p["bo_ca"], x_flat, *p["ln2"])

    x_flat = ffn_res_ln(x_flat, p["ffn"], *p["ln3"])
    return x_flat


def transformer_forward(x, params, cfg):
    B, S, D = x.shape
    H = cfg["num_heads"]
    Dh = D // H
    pe = params["pe"][:S, :]
    x_flat = add_positional_encoding(x.reshape(B * S, D), pe, B, S, D)

    mem = x_flat
    for lp in params["encoder"]:
        mem = encoder_layer(mem, lp, B, S, D, H, Dh)

    out = x_flat
    for lp in params["decoder"]:
        out = decoder_layer(out, mem, lp, B, S, S, D, H, Dh)
    return out.reshape(B, S, D).astype(x.dtype)


# ----------------------------- Parameters -----------------------------

def positional_encoding(max_len, dim_embed):
    pos = jnp.arange(max_len, dtype=jnp.float32)[:, None]
    order = jnp.arange(dim_embed // 2, dtype=jnp.float32)[None, :]
    angle = pos / (10000.0 ** (2.0 * order / dim_embed))
    pe = jnp.zeros((max_len, dim_embed), jnp.float32)
    pe = pe.at[:, 0::2].set(jnp.sin(angle))
    pe = pe.at[:, 1::2].set(jnp.cos(angle))
    return pe


def _init_w(key, d_in, d_out):
    return (jax.random.normal(key, (d_in, d_out), jnp.float32) * 0.02).astype(PARAM_DTYPE)


def _init_b(d):
    return jnp.zeros((d,), jnp.float32)


def _init_ln(d):
    return (jnp.ones((d,), jnp.float32), jnp.zeros((d,), jnp.float32))


def _init_ffn(key, d, f):
    k1, k2 = jax.random.split(key)
    return {"w1": _init_w(k1, d, f), "b1": _init_b(f),
            "w2": _init_w(k2, f, d), "b2": _init_b(d)}


def init_params(key, cfg):
    d, f = cfg["dim_embed"], cfg["dim_ffn"]
    enc, dec = [], []
    for _ in range(cfg["num_enc_layers"]):
        key, k1, k2, k3 = jax.random.split(key, 4)
        enc.append({
            "wqkv": _init_w(k1, d, 3 * d), "bqkv": _init_b(3 * d),
            "wo": _init_w(k2, d, d), "bo": _init_b(d), "ln1": _init_ln(d),
            "ffn": _init_ffn(k3, d, f), "ln2": _init_ln(d),
        })
    for _ in range(cfg["num_dec_layers"]):
        key, k1, k2, k3, k4, k5, k6 = jax.random.split(key, 7)
        dec.append({
            "wqkv": _init_w(k1, d, 3 * d), "bqkv": _init_b(3 * d),
            "wo_sa": _init_w(k2, d, d), "bo_sa": _init_b(d), "ln1": _init_ln(d),
            "wq_ca": _init_w(k3, d, d), "bq_ca": _init_b(d),
            "wkv_ca": _init_w(k4, d, 2 * d), "bkv_ca": _init_b(2 * d),
            "wo_ca": _init_w(k5, d, d), "bo_ca": _init_b(d), "ln2": _init_ln(d),
            "ffn": _init_ffn(k6, d, f), "ln3": _init_ln(d),
        })
    return {"pe": positional_encoding(cfg["max_len"], d), "encoder": enc, "decoder": dec}


# ----------------------------- Main -----------------------------

if __name__ == "__main__":
    cfg = {
        "dim_embed": 32,
        "num_heads": 4,
        "dim_ffn": 64,
        "num_enc_layers": 2,
        "num_dec_layers": 2,
        "max_len": 16,
    }
    batch, seq = 2, 8

    key = jax.random.PRNGKey(0)
    k_params, k_x = jax.random.split(key)
    params = init_params(k_params, cfg)
    x = jax.random.normal(k_x, (batch, seq, cfg["dim_embed"]), jnp.float32)

    fwd = jax.jit(functools.partial(transformer_forward, cfg=cfg))
    out = fwd(x, params)
    jax.block_until_ready(out)

    assert out.shape == (batch, seq, cfg["dim_embed"])
    assert jnp.all(jnp.isfinite(out))
    print("KERNEL_OK")
</pallas_src>

<mosaic_0001>
module attributes {stable_mosaic.version = 11 : i64} {
  func.func @_linear_kernel(%arg0: i32, %arg1: i32, %arg2: i32, %arg3: memref<16x32xbf16, #tpu.memory_space<vmem>>, %arg4: memref<32x96xbf16, #tpu.memory_space<vmem>>, %arg5: memref<1x96xf32, #tpu.memory_space<vmem>>, %arg6: memref<16x96xbf16, #tpu.memory_space<vmem>>, %arg7: memref<16x96xf32, #tpu.memory_space<vmem>>) attributes {dimension_semantics = [#tpu.dimension_semantics<parallel>, #tpu.dimension_semantics<parallel>, #tpu.dimension_semantics<arbitrary>], iteration_bounds = array<i64: 1, 1, 1>, scalar_prefetch = 0 : i64, scratch_operands = 1 : i64, tpu.core_type = #tpu.core_type<tc>, window_params = [{transform_indices = @transform_0, window_bounds = array<i64: 16, 32>}, {transform_indices = @transform_1, window_bounds = array<i64: 32, 96>}, {transform_indices = @transform_2, window_bounds = array<i64: 1, 96>}, {transform_indices = @transform_3, window_bounds = array<i64: 16, 96>}]} {
    %c0_i32 = arith.constant 0 : i32
    %0 = arith.cmpi eq, %arg2, %c0_i32 : i32
    %1 = arith.extui %0 : i1 to i32
    %c0_i32_0 = arith.constant 0 : i32
    %2 = arith.cmpi ne, %1, %c0_i32_0 : i32
    scf.if %2 {
      %cst_10 = arith.constant 0.000000e+00 : f32
      %12 = vector.broadcast %cst_10 : f32 to vector<16x96xf32>
      %c0_11 = arith.constant 0 : index
      %c0_12 = arith.constant 0 : index
      %13 = vector.load %arg7[%c0_11, %c0_12] : memref<16x96xf32, #tpu.memory_space<vmem>>, vector<16x96xf32>
      tpu.vector_store %arg7[%c0_11, %c0_12], %12 {strides = array<i32>} : memref<16x96xf32, #tpu.memory_space<vmem>>, vector<16x96xf32>,
    } else {
    }
    %c0 = arith.constant 0 : index
    %c0_1 = arith.constant 0 : index
    %3 = vector.load %arg7[%c0, %c0_1] : memref<16x96xf32, #tpu.memory_space<vmem>>, vector<16x96xf32>
    %c0_2 = arith.constant 0 : index
    %c0_3 = arith.constant 0 : index
    %4 = vector.load %arg3[%c0_2, %c0_3] : memref<16x32xbf16, #tpu.memory_space<vmem>>, vector<16x32xbf16>
    %c0_4 = arith.constant 0 : index
    %c0_5 = arith.constant 0 : index
    %5 = vector.load %arg4[%c0_4, %c0_5] : memref<32x96xbf16, #tpu.memory_space<vmem>>, vector<32x96xbf16>
    %cst = arith.constant dense<0.000000e+00> : vector<16x96xf32>
    %6 = tpu.matmul %4, %5, %cst {dimension_numbers = #tpu.dot_dimension_numbers<[1], [0], [0], [1], [0, 0, 1, 1], [], []>} : vector<16x32xbf16>, vector<32x96xbf16>, vector<16x96xf32> -> vector<16x96xf32>
    %7 = arith.addf %3, %6 : vector<16x96xf32>
    %c0_6 = arith.constant 0 : index
    %c0_7 = arith.constant 0 : index
    %8 = vector.load %arg7[%c0_6, %c0_7] : memref<16x96xf32, #tpu.memory_space<vmem>>, vector<16x96xf32>
    tpu.vector_store %arg7[%c0_6, %c0_7], %7 {strides = array<i32>} : memref<16x96xf32, #tpu.memory_space<vmem>>, vector<16x96xf32>,
    %c0_i32_8 = arith.constant 0 : i32
    %9 = arith.cmpi eq, %arg2, %c0_i32_8 : i32
    %10 = arith.extui %9 : i1 to i32
    %c0_i32_9 = arith.constant 0 : i32
    %11 = arith.cmpi ne, %10, %c0_i32_9 : i32
    scf.if %11 {
      %c0_10 = arith.constant 0 : index
      %c0_11 = arith.constant 0 : index
      %12 = vector.load %arg7[%c0_10, %c0_11] : memref<16x96xf32, #tpu.memory_space<vmem>>, vector<16x96xf32>
      %c0_12 = arith.constant 0 : index
      %c0_13 = arith.constant 0 : index
      %13 = vector.load %arg5[%c0_12, %c0_13] : memref<1x96xf32, #tpu.memory_space<vmem>>, vector<1x96xf32>
      %14 = vector.broadcast %13 : vector<1x96xf32> to vector<16x96xf32>
      %15 = arith.addf %12, %14 : vector<16x96xf32>
      %16 = arith.truncf %15 : vector<16x96xf32> to vector<16x96xbf16>
      %c0_14 = arith.constant 0 : index
      %c0_15 = arith.constant 0 : index
      %17 = vector.load %arg6[%c0_14, %c0_15] : memref<16x96xbf16, #tpu.memory_space<vmem>>, vector<16x96xbf16>
      tpu.vector_store %arg6[%c0_14, %c0_15], %16 {strides = array<i32>} : memref<16x96xbf16, #tpu.memory_space<vmem>>, vector<16x96xbf16>,
    } else {
    }
    return
  }
  func.func @transform_0(%arg0: i32, %arg1: i32, %arg2: i32) -> (i32, i32) {
    %c0_i32 = arith.constant 0 : i32
    return %arg0, %arg2 : i32, i32
  }
  func.func @transform_1(%arg0: i32, %arg1: i32, %arg2: i32) -> (i32, i32) {
    %c0_i32 = arith.constant 0 : i32
    return %arg2, %arg1 : i32, i32
  }
  func.func @transform_2(%arg0: i32, %arg1: i32, %arg2: i32) -> (i32, i32) {
    %c0_i32 = arith.constant 0 : i32
    %c0_i32_0 = arith.constant 0 : i32
    return %c0_i32, %arg1 : i32, i32
  }
  func.func @transform_3(%arg0: i32, %arg1: i32, %arg2: i32) -> (i32, i32) {
    %c0_i32 = arith.constant 0 : i32
    return %arg0, %arg1 : i32, i32
  }
}

module attributes {stable_mosaic.version = 11 : i64} {
  func.func @_attn_kernel(%arg0: i32, %arg1: i32, %arg2: memref<1x8x96xbf16, #tpu.memory_space<vmem>>, %arg3: memref<1x8x96xbf16, #tpu.memory_space<vmem>>, %arg4: memref<1x8x32xbf16, #tpu.memory_space<vmem>>) attributes {dimension_semantics = [#tpu.dimension_semantics<parallel>, #tpu.dimension_semantics<parallel>], iteration_bounds = array<i64: 2, 1>, scalar_prefetch = 0 : i64, scratch_operands = 0 : i64, tpu.core_type = #tpu.core_type<tc>, window_params = [{transform_indices = @transform_0, window_bounds = array<i64: 1, 8, 96>}, {transform_indices = @transform_1, window_bounds = array<i64: 1, 8, 96>}, {transform_indices = @transform_2, window_bounds = array<i64: 1, 8, 32>}]} {
    %c0 = arith.constant 0 : index
    %c0_0 = arith.constant 0 : index
    %c0_1 = arith.constant 0 : index
    %0 = vector.load %arg2[%c0, %c0_0, %c0_1] : memref<1x8x96xbf16, #tpu.memory_space<vmem>>, vector<1x8x96xbf16>
    %1 = vector.shape_cast %0 : vector<1x8x96xbf16> to vector<8x96xbf16>
    %c0_2 = arith.constant 0 : index
    %c0_3 = arith.constant 0 : index
    %c0_4 = arith.constant 0 : index
    %2 = vector.load %arg3[%c0_2, %c0_3, %c0_4] : memref<1x8x96xbf16, #tpu.memory_space<vmem>>, vector<1x8x96xbf16>
    %3 = vector.shape_cast %2 : vector<1x8x96xbf16> to vector<8x96xbf16>
    %4 = vector.extract_strided_slice %1 {offsets = [0, 0], sizes = [8, 8], strides = [1, 1]} : vector<8x96xbf16> to vector<8x8xbf16>
    %5 = vector.extract_strided_slice %3 {offsets = [0, 32], sizes = [8, 8], strides = [1, 1]} : vector<8x96xbf16> to vector<8x8xbf16>
    %6 = vector.extract_strided_slice %3 {offsets = [0, 64], sizes = [8, 8], strides = [1, 1]} : vector<8x96xbf16> to vector<8x8xbf16>
    %cst = arith.constant dense<0.000000e+00> : vector<8x8xf32>
    %7 = tpu.matmul %4, %5, %cst {dimension_numbers = #tpu.dot_dimension_numbers<[1], [1], [0], [0], [0, 0, 1, 0], [], []>} : vector<8x8xbf16>, vector<8x8xbf16>, vector<8x8xf32> -> vector<8x8xf32>
    %cst_5 = arith.constant 0.353553385 : f32
    %8 = vector.broadcast %cst_5 : f32 to vector<8x8xf32>
    %9 = arith.mulf %7, %8 : vector<8x8xf32>
    %cst_6 = arith.constant dense<0xFF800000> : vector<8xf32>
    %10 = vector.multi_reduction <maximumf>, %9, %cst_6 [1] : vector<8x8xf32> to vector<8xf32>
    %11 = vector.shape_cast %10 : vector<8xf32> to vector<8x1xf32>
    %12 = vector.broadcast %11 : vector<8x1xf32> to vector<8x8xf32>
    %13 = arith.subf %9, %12 : vector<8x8xf32>
    %14 = math.exp %13 : vector<8x8xf32>
    %cst_7 = arith.constant dense<0.000000e+00> : vector<8xf32>
    %15 = vector.multi_reduction <add>, %14, %cst_7 [1] : vector<8x8xf32> to vector<8xf32>
    %16 = vector.shape_cast %15 : vector<8xf32> to vector<8x1xf32>
    %17 = tpu.reciprocal %16 {approx = true} : vector<8x1xf32> -> vector<8x1xf32>
    %18 = vector.broadcast %17 : vector<8x1xf32> to vector<8x8xf32>
    %19 = arith.mulf %14, %18 : vector<8x8xf32>
    %20 = arith.truncf %19 : vector<8x8xf32> to vector<8x8xbf16>
    %cst_8 = arith.constant dense<0.000000e+00> : vector<8x8xf32>
    %21 = tpu.matmul %20, %6, %cst_8 {dimension_numbers = #tpu.dot_dimension_numbers<[1], [0], [0], [1], [0, 0, 1, 1], [], []>} : vector<8x8xbf16>, vector<8x8xbf16>, vector<8x8xf32> -> vector<8x8xf32>
    %22 = vector.extract_strided_slice %1 {offsets = [0, 8], sizes = [8, 8], strides = [1, 1]} : vector<8x96xbf16> to vector<8x8xbf16>
    %23 = vector.extract_strided_slice %3 {offsets = [0, 40], sizes = [8, 8], strides = [1, 1]} : vector<8x96xbf16> to vector<8x8xbf16>
    %24 = vector.extract_strided_slice %3 {offsets = [0, 72], sizes = [8, 8], strides = [1, 1]} : vector<8x96xbf16> to vector<8x8xbf16>
    %cst_9 = arith.constant dense<0.000000e+00> : vector<8x8xf32>
    %25 = tpu.matmul %22, %23, %cst_9 {dimension_numbers = #tpu.dot_dimension_numbers<[1], [1], [0], [0], [0, 0, 1, 0], [], []>} : vector<8x8xbf16>, vector<8x8xbf16>, vector<8x8xf32> -> vector<8x8xf32>
    %cst_10 = arith.constant 0.353553385 : f32
    %26 = vector.broadcast %cst_10 : f32 to vector<8x8xf32>
    %27 = arith.mulf %25, %26 : vector<8x8xf32>
    %cst_11 = arith.constant dense<0xFF800000> : vector<8xf32>
    %28 = vector.multi_reduction <maximumf>, %27, %cst_11 [1] : vector<8x8xf32> to vector<8xf32>
    %29 = vector.shape_cast %28 : vector<8xf32> to vector<8x1xf32>
    %30 = vector.broadcast %29 : vector<8x1xf32> to vector<8x8xf32>
    %31 = arith.subf %27, %30 : vector<8x8xf32>
    %32 = math.exp %31 : vector<8x8xf32>
    %cst_12 = arith.constant dense<0.000000e+00> : vector<8xf32>
    %33 = vector.multi_reduction <add>, %32, %cst_12 [1] : vector<8x8xf32> to vector<8xf32>
    %34 = vector.shape_cast %33 : vector<8xf32> to vector<8x1xf32>
    %35 = tpu.reciprocal %34 {approx = true} : vector<8x1xf32> -> vector<8x1xf32>
    %36 = vector.broadcast %35 : vector<8x1xf32> to vector<8x8xf32>
    %37 = arith.mulf %32, %36 : vector<8x8xf32>
    %38 = arith.truncf %37 : vector<8x8xf32> to vector<8x8xbf16>
    %cst_13 = arith.constant dense<0.000000e+00> : vector<8x8xf32>
    %39 = tpu.matmul %38, %24, %cst_13 {dimension_numbers = #tpu.dot_dimension_numbers<[1], [0], [0], [1], [0, 0, 1, 1], [], []>} : vector<8x8xbf16>, vector<8x8xbf16>, vector<8x8xf32> -> vector<8x8xf32>
    %40 = vector.extract_strided_slice %1 {offsets = [0, 16], sizes = [8, 8], strides = [1, 1]} : vector<8x96xbf16> to vector<8x8xbf16>
    %41 = vector.extract_strided_slice %3 {offsets = [0, 48], sizes = [8, 8], strides = [1, 1]} : vector<8x96xbf16> to vector<8x8xbf16>
    %42 = vector.extract_strided_slice %3 {offsets = [0, 80], sizes = [8, 8], strides = [1, 1]} : vector<8x96xbf16> to vector<8x8xbf16>
    %cst_14 = arith.constant dense<0.000000e+00> : vector<8x8xf32>
    %43 = tpu.matmul %40, %41, %cst_14 {dimension_numbers = #tpu.dot_dimension_numbers<[1], [1], [0], [0], [0, 0, 1, 0], [], []>} : vector<8x8xbf16>, vector<8x8xbf16>, vector<8x8xf32> -> vector<8x8xf32>
    %cst_15 = arith.constant 0.353553385 : f32
    %44 = vector.broadcast %cst_15 : f32 to vector<8x8xf32>
    %45 = arith.mulf %43, %44 : vector<8x8xf32>
    %cst_16 = arith.constant dense<0xFF800000> : vector<8xf32>
    %46 = vector.multi_reduction <maximumf>, %45, %cst_16 [1] : vector<8x8xf32> to vector<8xf32>
    %47 = vector.shape_cast %46 : vector<8xf32> to vector<8x1xf32>
    %48 = vector.broadcast %47 : vector<8x1xf32> to vector<8x8xf32>
    %49 = arith.subf %45, %48 : vector<8x8xf32>
    %50 = math.exp %49 : vector<8x8xf32>
    %cst_17 = arith.constant dense<0.000000e+00> : vector<8xf32>
    %51 = vector.multi_reduction <add>, %50, %cst_17 [1] : vector<8x8xf32> to vector<8xf32>
    %52 = vector.shape_cast %51 : vector<8xf32> to vector<8x1xf32>
    %53 = tpu.reciprocal %52 {approx = true} : vector<8x1xf32> -> vector<8x1xf32>
    %54 = vector.broadcast %53 : vector<8x1xf32> to vector<8x8xf32>
    %55 = arith.mulf %50, %54 : vector<8x8xf32>
    %56 = arith.truncf %55 : vector<8x8xf32> to vector<8x8xbf16>
    %cst_18 = arith.constant dense<0.000000e+00> : vector<8x8xf32>
    %57 = tpu.matmul %56, %42, %cst_18 {dimension_numbers = #tpu.dot_dimension_numbers<[1], [0], [0], [1], [0, 0, 1, 1], [], []>} : vector<8x8xbf16>, vector<8x8xbf16>, vector<8x8xf32> -> vector<8x8xf32>
    %58 = vector.extract_strided_slice %1 {offsets = [0, 24], sizes = [8, 8], strides = [1, 1]} : vector<8x96xbf16> to vector<8x8xbf16>
    %59 = vector.extract_strided_slice %3 {offsets = [0, 56], sizes = [8, 8], strides = [1, 1]} : vector<8x96xbf16> to vector<8x8xbf16>
    %60 = vector.extract_strided_slice %3 {offsets = [0, 88], sizes = [8, 8], strides = [1, 1]} : vector<8x96xbf16> to vector<8x8xbf16>
    %cst_19 = arith.constant dense<0.000000e+00> : vector<8x8xf32>
    %61 = tpu.matmul %58, %59, %cst_19 {dimension_numbers = #tpu.dot_dimension_numbers<[1], [1], [0], [0], [0, 0, 1, 0], [], []>} : vector<8x8xbf16>, vector<8x8xbf16>, vector<8x8xf32> -> vector<8x8xf32>
    %cst_20 = arith.constant 0.353553385 : f32
    %62 = vector.broadcast %cst_20 : f32 to vector<8x8xf32>
    %63 = arith.mulf %61, %62 : vector<8x8xf32>
    %cst_21 = arith.constant dense<0xFF800000> : vector<8xf32>
    %64 = vector.multi_reduction <maximumf>, %63, %cst_21 [1] : vector<8x8xf32> to vector<8xf32>
    %65 = vector.shape_cast %64 : vector<8xf32> to vector<8x1xf32>
    %66 = vector.broadcast %65 : vector<8x1xf32> to vector<8x8xf32>
    %67 = arith.subf %63, %66 : vector<8x8xf32>
    %68 = math.exp %67 : vector<8x8xf32>
    %cst_22 = arith.constant dense<0.000000e+00> : vector<8xf32>
    %69 = vector.multi_reduction <add>, %68, %cst_22 [1] : vector<8x8xf32> to vector<8xf32>
    %70 = vector.shape_cast %69 : vector<8xf32> to vector<8x1xf32>
    %71 = tpu.reciprocal %70 {approx = true} : vector<8x1xf32> -> vector<8x1xf32>
    %72 = vector.broadcast %71 : vector<8x1xf32> to vector<8x8xf32>
    %73 = arith.mulf %68, %72 : vector<8x8xf32>
    %74 = arith.truncf %73 : vector<8x8xf32> to vector<8x8xbf16>
    %cst_23 = arith.constant dense<0.000000e+00> : vector<8x8xf32>
    %75 = tpu.matmul %74, %60, %cst_23 {dimension_numbers = #tpu.dot_dimension_numbers<[1], [0], [0], [1], [0, 0, 1, 1], [], []>} : vector<8x8xbf16>, vector<8x8xbf16>, vector<8x8xf32> -> vector<8x8xf32>
    %76 = tpu.concatenate %21, %39, %57, %75 in 1 : vector<8x8xf32>, vector<8x8xf32>, vector<8x8xf32>, vector<8x8xf32> -> vector<8x32xf32>
    %77 = arith.truncf %76 : vector<8x32xf32> to vector<8x32xbf16>
    %c0_24 = arith.constant 0 : index
    %c0_25 = arith.constant 0 : index
    %c0_26 = arith.constant 0 : index
    %78 = vector.load %arg4[%c0_24, %c0_25, %c0_26] : memref<1x8x32xbf16, #tpu.memory_space<vmem>>, vector<1x8x32xbf16>
    %79 = vector.shape_cast %78 : vector<1x8x32xbf16> to vector<8x32xbf16>
    %80 = vector.shape_cast %77 : vector<8x32xbf16> to vector<1x8x32xbf16>
    tpu.vector_store %arg4[%c0_24, %c0_25, %c0_26], %80 {strides = array<i32>} : memref<1x8x32xbf16, #tpu.memory_space<vmem>>, vector<1x8x32xbf16>,
    return
  }
  func.func @transform_0(%arg0: i32, %arg1: i32) -> (i32, i32, i32) {
    %c0_i32 = arith.constant 0 : i32
    %c0_i32_0 = arith.constant 0 : i32
    return %arg0, %arg1, %c0_i32 : i32, i32, i32
  }
  func.func @transform_1(%arg0: i32, %arg1: i32) -> (i32, i32, i32) {
    %c0_i32 = arith.constant 0 : i32
    %c0_i32_0 = arith.constant 0 : i32
    %c0_i32_1 = arith.constant 0 : i32
    return %arg0, %c0_i32, %c0_i32_0 : i32, i32, i32
  }
  func.func @transform_2(%arg0: i32, %arg1: i32) -> (i32, i32, i32) {
    %c0_i32 = arith.constant 0 : i32
    %c0_i32_0 = arith.constant 0 : i32
    return %arg0, %arg1, %c0_i32 : i32, i32, i32
  }
}

module attributes {stable_mosaic.version = 11 : i64} {
  func.func @_add_pe_kernel(%arg0: i32, %arg1: memref<8x32xf32, #tpu.memory_space<vmem>>, %arg2: memref<8x32xf32, #tpu.memory_space<vmem>>, %arg3: memref<8x32xbf16, #tpu.memory_space<vmem>>) attributes {dimension_semantics = [#tpu.dimension_semantics<parallel>], iteration_bounds = array<i64: 2>, scalar_prefetch = 0 : i64, scratch_operands = 0 : i64, tpu.core_type = #tpu.core_type<tc>, window_params = [{transform_indices = @transform_0, window_bounds = array<i64: 8, 32>}, {pipeline_mode = #tpu.pipeline_mode<synchronous>, transform_indices = @transform_1, window_bounds = array<i64: 8, 32>}, {transform_indices = @transform_2, window_bounds = array<i64: 8, 32>}]} {
    %c0 = arith.constant 0 : index
    %c0_0 = arith.constant 0 : index
    %0 = vector.load %arg1[%c0, %c0_0] : memref<8x32xf32, #tpu.memory_space<vmem>>, vector<8x32xf32>
    %c0_1 = arith.constant 0 : index
    %c0_2 = arith.constant 0 : index
    %1 = vector.load %arg2[%c0_1, %c0_2] : memref<8x32xf32, #tpu.memory_space<vmem>>, vector<8x32xf32>
    %2 = arith.addf %0, %1 : vector<8x32xf32>
    %3 = arith.truncf %2 : vector<8x32xf32> to vector<8x32xbf16>
    %c0_3 = arith.constant 0 : index
    %c0_4 = arith.constant 0 : index
    %4 = vector.load %arg3[%c0_3, %c0_4] : memref<8x32xbf16, #tpu.memory_space<vmem>>, vector<8x32xbf16>
    tpu.vector_store %arg3[%c0_3, %c0_4], %3 {strides = array<i32>} : memref<8x32xbf16, #tpu.memory_space<vmem>>, vector<8x32xbf16>,
    return
  }
  func.func @transform_0(%arg0: i32) -> (i32, i32) {
    %c0_i32 = arith.constant 0 : i32
    %c0_i32_0 = arith.constant 0 : i32
    return %arg0, %c0_i32 : i32, i32
  }
  func.func @transform_1(%arg0: i32) -> (i32, i32) {
    %c0_i32 = arith.constant 0 : i32
    %c0_i32_0 = arith.constant 0 : i32
    %c0_i32_1 = arith.constant 0 : i32
    return %c0_i32, %c0_i32_0 : i32, i32
  }
  func.func @transform_2(%arg0: i32) -> (i32, i32) {
    %c0_i32 = arith.constant 0 : i32
    %c0_i32_0 = arith.constant 0 : i32
    return %arg0, %c0_i32 : i32, i32
  }
}

module attributes {stable_mosaic.version = 11 : i64} {
  func.func @_linear_res_ln_kernel(%arg0: i32, %arg1: i32, %arg2: memref<16x32xbf16, #tpu.memory_space<vmem>>, %arg3: memref<32x32xbf16, #tpu.memory_space<vmem>>, %arg4: memref<1x32xf32, #tpu.memory_space<vmem>>, %arg5: memref<16x32xbf16, #tpu.memory_space<vmem>>, %arg6: memref<1x32xf32, #tpu.memory_space<vmem>>, %arg7: memref<1x32xf32, #tpu.memory_space<vmem>>, %arg8: memref<16x32xbf16, #tpu.memory_space<vmem>>, %arg9: memref<16x32xf32, #tpu.memory_space<vmem>>) attributes {dimension_semantics = [#tpu.dimension_semantics<parallel>, #tpu.dimension_semantics<arbitrary>], iteration_bounds = array<i64: 1, 1>, scalar_prefetch = 0 : i64, scratch_operands = 1 : i64, tpu.core_type = #tpu.core_type<tc>, window_params = [{transform_indices = @transform_0, window_bounds = array<i64: 16, 32>}, {transform_indices = @transform_1, window_bounds = array<i64: 32, 32>}, {pipeline_mode = #tpu.pipeline_mode<synchronous>, transform_indices = @transform_2, window_bounds = array<i64: 1, 32>}, {transform_indices = @transform_3, window_bounds = array<i64: 16, 32>}, {pipeline_mode = #tpu.pipeline_mode<synchronous>, transform_indices = @transform_4, window_bounds = array<i64: 1, 32>}, {pipeline_mode = #tpu.pipeline_mode<synchronous>, transform_indices = @transform_5, window_bounds = array<i64: 1, 32>}, {transform_indices = @transform_6, window_bounds = array<i64: 16, 32>}]} {
    %c0_i32 = arith.constant 0 : i32
    %0 = arith.cmpi eq, %arg1, %c0_i32 : i32
    %1 = arith.extui %0 : i1 to i32
    %c0_i32_0 = arith.constant 0 : i32
    %2 = arith.cmpi ne, %1, %c0_i32_0 : i32
    scf.if %2 {
      %cst_10 = arith.constant 0.000000e+00 : f32
      %12 = vector.broadcast %cst_10 : f32 to vector<16x32xf32>
      %c0_11 = arith.constant 0 : index
      %c0_12 = arith.constant 0 : index
      %13 = vector.load %arg9[%c0_11, %c0_12] : memref<16x32xf32, #tpu.memory_space<vmem>>, vector<16x32xf32>
      tpu.vector_store %arg9[%c0_11, %c0_12], %12 {strides = array<i32>} : memref<16x32xf32, #tpu.memory_space<vmem>>, vector<16x32xf32>,
    } else {
    }
    %c0 = arith.constant 0 : index
    %c0_1 = arith.constant 0 : index
    %3 = vector.load %arg9[%c0, %c0_1] : memref<16x32xf32, #tpu.memory_space<vmem>>, vector<16x32xf32>
    %c0_2 = arith.constant 0 : index
    %c0_3 = arith.constant 0 : index
    %4 = vector.load %arg2[%c0_2, %c0_3] : memref<16x32xbf16, #tpu.memory_space<vmem>>, vector<16x32xbf16>
    %c0_4 = arith.constant 0 : index
    %c0_5 = arith.constant 0 : index
    %5 = vector.load %arg3[%c0_4, %c0_5] : memref<32x32xbf16, #tpu.memory_space<vmem>>, vector<32x32xbf16>
    %cst = arith.constant dense<0.000000e+00> : vector<16x32xf32>
    %6 = tpu.matmul %4, %5, %cst {dimension_numbers = #tpu.dot_dimension_numbers<[1], [0], [0], [1], [0, 0, 1, 1], [], []>} : vector<16x32xbf16>, vector<32x32xbf16>, vector<16x32xf32> -> vector<16x32xf32>
    %7 = arith.addf %3, %6 : vector<16x32xf32>
    %c0_6 = arith.constant 0 : index
    %c0_7 = arith.constant 0 : index
    %8 = vector.load %arg9[%c0_6, %c0_7] : memref<16x32xf32, #tpu.memory_space<vmem>>, vector<16x32xf32>
    tpu.vector_store %arg9[%c0_6, %c0_7], %7 {strides = array<i32>} : memref<16x32xf32, #tpu.memory_space<vmem>>, vector<16x32xf32>,
    %c0_i32_8 = arith.constant 0 : i32
    %9 = arith.cmpi eq, %arg1, %c0_i32_8 : i32
    %10 = arith.extui %9 : i1 to i32
    %c0_i32_9 = arith.constant 0 : i32
    %11 = arith.cmpi ne, %10, %c0_i32_9 : i32
    scf.if %11 {
      %c0_10 = arith.constant 0 : index
      %c0_11 = arith.constant 0 : index
      %12 = vector.load %arg9[%c0_10, %c0_11] : memref<16x32xf32, #tpu.memory_space<vmem>>, vector<16x32xf32>
      %c0_12 = arith.constant 0 : index
      %c0_13 = arith.constant 0 : index
      %13 = vector.load %arg4[%c0_12, %c0_13] : memref<1x32xf32, #tpu.memory_space<vmem>>, vector<1x32xf32>
      %14 = vector.broadcast %13 : vector<1x32xf32> to vector<16x32xf32>
      %15 = arith.addf %12, %14 : vector<16x32xf32>
      %c0_14 = arith.constant 0 : index
      %c0_15 = arith.constant 0 : index
      %16 = vector.load %arg5[%c0_14, %c0_15] : memref<16x32xbf16, #tpu.memory_space<vmem>>, vector<16x32xbf16>
      %17 = arith.extf %16 : vector<16x32xbf16> to vector<16x32xf32>
      %18 = arith.addf %15, %17 : vector<16x32xf32>
      %cst_16 = arith.constant dense<0.000000e+00> : vector<16xf32>
      %19 = vector.multi_reduction <add>, %18, %cst_16 [1] : vector<16x32xf32> to vector<16xf32>
      %20 = vector.shape_cast %19 : vector<16xf32> to vector<16x1xf32>
      %cst_17 = arith.constant 3.200000e+01 : f32
      %21 = vector.broadcast %cst_17 : f32 to vector<16x1xf32>
      %22 = arith.divf %20, %21 : vector<16x1xf32>
      %23 = vector.broadcast %22 : vector<16x1xf32> to vector<16x32xf32>
      %24 = arith.subf %18, %23 : vector<16x32xf32>
      %25 = arith.mulf %24, %24 : vector<16x32xf32>
      %cst_18 = arith.constant dense<0.000000e+00> : vector<16xf32>
      %26 = vector.multi_reduction <add>, %25, %cst_18 [1] : vector<16x32xf32> to vector<16xf32>
      %27 = vector.shape_cast %26 : vector<16xf32> to vector<16x1xf32>
      %cst_19 = arith.constant 3.200000e+01 : f32
      %28 = vector.broadcast %cst_19 : f32 to vector<16x1xf32>
      %29 = arith.divf %27, %28 : vector<16x1xf32>
      %30 = vector.broadcast %22 : vector<16x1xf32> to vector<16x32xf32>
      %31 = arith.subf %18, %30 : vector<16x32xf32>
      %cst_20 = arith.constant 9.99999974E-6 : f32
      %32 = vector.broadcast %cst_20 : f32 to vector<16x1xf32>
      %33 = arith.addf %29, %32 : vector<16x1xf32>
      %34 = math.rsqrt %33 : vector<16x1xf32>
      %35 = vector.broadcast %34 : vector<16x1xf32> to vector<16x32xf32>
      %36 = arith.mulf %31, %35 : vector<16x32xf32>
      %c0_21 = arith.constant 0 : index
      %c0_22 = arith.constant 0 : index
      %37 = vector.load %arg6[%c0_21, %c0_22] : memref<1x32xf32, #tpu.memory_space<vmem>>, vector<1x32xf32>
      %38 = vector.broadcast %37 : vector<1x32xf32> to vector<16x32xf32>
      %39 = arith.mulf %36, %38 : vector<16x32xf32>
      %c0_23 = arith.constant 0 : index
      %c0_24 = arith.constant 0 : index
      %40 = vector.load %arg7[%c0_23, %c0_24] : memref<1x32xf32, #tpu.memory_space<vmem>>, vector<1x32xf32>
      %41 = vector.broadcast %40 : vector<1x32xf32> to vector<16x32xf32>
      %42 = arith.addf %39, %41 : vector<16x32xf32>
      %43 = arith.truncf %42 : vector<16x32xf32> to vector<16x32xbf16>
      %c0_25 = arith.constant 0 : index
      %c0_26 = arith.constant 0 : index
      %44 = vector.load %arg8[%c0_25, %c0_26] : memref<16x32xbf16, #tpu.memory_space<vmem>>, vector<16x32xbf16>
      tpu.vector_store %arg8[%c0_25, %c0_26], %43 {strides = array<i32>} : memref<16x32xbf16, #tpu.memory_space<vmem>>, vector<16x32xbf16>,
    } else {
    }
    return
  }
  func.func @transform_0(%arg0: i32, %arg1: i32) -> (i32, i32) {
    %c0_i32 = arith.constant 0 : i32
    return %arg0, %arg1 : i32, i32
  }
  func.func @transform_1(%arg0: i32, %arg1: i32) -> (i32, i32) {
    %c0_i32 = arith.constant 0 : i32
    %c0_i32_0 = arith.constant 0 : i32
    return %arg1, %c0_i32 : i32, i32
  }
  func.func @transform_2(%arg0: i32, %arg1: i32) -> (i32, i32) {
    %c0_i32 = arith.constant 0 : i32
    %c0_i32_0 = arith.constant 0 : i32
    %c0_i32_1 = arith.constant 0 : i32
    return %c0_i32, %c0_i32_0 : i32, i32
  }
  func.func @transform_3(%arg0: i32, %arg1: i32) -> (i32, i32) {
    %c0_i32 = arith.constant 0 : i32
    %c0_i32_0 = arith.constant 0 : i32
    return %arg0, %c0_i32 : i32, i32
  }
  func.func @transform_4(%arg0: i32, %arg1: i32) -> (i32, i32) {
    %c0_i32 = arith.constant 0 : i32
    %c0_i32_0 = arith.constant 0 : i32
    %c0_i32_1 = arith.constant 0 : i32
    return %c0_i32, %c0_i32_0 : i32, i32
  }
  func.func @transform_5(%arg0: i32, %arg1: i32) -> (i32, i32) {
    %c0_i32 = arith.constant 0 : i32
    %c0_i32_0 = arith.constant 0 : i32
    %c0_i32_1 = arith.constant 0 : i32
    return %c0_i32, %c0_i32_0 : i32, i32
  }
  func.func @transform_6(%arg0: i32, %arg1: i32) -> (i32, i32) {
    %c0_i32 = arith.constant 0 : i32
    %c0_i32_0 = arith.constant 0 : i32
    return %arg0, %c0_i32 : i32, i32
  }
}

module attributes {stable_mosaic.version = 11 : i64} {
  func.func @_linear_kernel(%arg0: i32, %arg1: i32, %arg2: i32, %arg3: memref<16x32xbf16, #tpu.memory_space<vmem>>, %arg4: memref<32x64xbf16, #tpu.memory_space<vmem>>, %arg5: memref<1x64xf32, #tpu.memory_space<vmem>>, %arg6: memref<16x64xbf16, #tpu.memory_space<vmem>>, %arg7: memref<16x64xf32, #tpu.memory_space<vmem>>) attributes {dimension_semantics = [#tpu.dimension_semantics<parallel>, #tpu.dimension_semantics<parallel>, #tpu.dimension_semantics<arbitrary>], iteration_bounds = array<i64: 1, 1, 1>, scalar_prefetch = 0 : i64, scratch_operands = 1 : i64, tpu.core_type = #tpu.core_type<tc>, window_params = [{transform_indices = @transform_0, window_bounds = array<i64: 16, 32>}, {transform_indices = @transform_1, window_bounds = array<i64: 32, 64>}, {transform_indices = @transform_2, window_bounds = array<i64: 1, 64>}, {transform_indices = @transform_3, window_bounds = array<i64: 16, 64>}]} {
    %c0_i32 = arith.constant 0 : i32
    %0 = arith.cmpi eq, %arg2, %c0_i32 : i32
    %1 = arith.extui %0 : i1 to i32
    %c0_i32_0 = arith.constant 0 : i32
    %2 = arith.cmpi ne, %1, %c0_i32_0 : i32
    scf.if %2 {
      %cst_10 = arith.constant 0.000000e+00 : f32
      %12 = vector.broadcast %cst_10 : f32 to vector<16x64xf32>
      %c0_11 = arith.constant 0 : index
      %c0_12 = arith.constant 0 : index
      %13 = vector.load %arg7[%c0_11, %c0_12] : memref<16x64xf32, #tpu.memory_space<vmem>>, vector<16x64xf32>
      tpu.vector_store %arg7[%c0_11, %c0_12], %12 {strides = array<i32>} : memref<16x64xf32, #tpu.memory_space<vmem>>, vector<16x64xf32>,
    } else {
    }
    %c0 = arith.constant 0 : index
    %c0_1 = arith.constant 0 : index
    %3 = vector.load %arg7[%c0, %c0_1] : memref<16x64xf32, #tpu.memory_space<vmem>>, vector<16x64xf32>
    %c0_2 = arith.constant 0 : index
    %c0_3 = arith.constant 0 : index
    %4 = vector.load %arg3[%c0_2, %c0_3] : memref<16x32xbf16, #tpu.memory_space<vmem>>, vector<16x32xbf16>
    %c0_4 = arith.constant 0 : index
    %c0_5 = arith.constant 0 : index
    %5 = vector.load %arg4[%c0_4, %c0_5] : memref<32x64xbf16, #tpu.memory_space<vmem>>, vector<32x64xbf16>
    %cst = arith.constant dense<0.000000e+00> : vector<16x64xf32>
    %6 = tpu.matmul %4, %5, %cst {dimension_numbers = #tpu.dot_dimension_numbers<[1], [0], [0], [1], [0, 0, 1, 1], [], []>} : vector<16x32xbf16>, vector<32x64xbf16>, vector<16x64xf32> -> vector<16x64xf32>
    %7 = arith.addf %3, %6 : vector<16x64xf32>
    %c0_6 = arith.constant 0 : index
    %c0_7 = arith.constant 0 : index
    %8 = vector.load %arg7[%c0_6, %c0_7] : memref<16x64xf32, #tpu.memory_space<vmem>>, vector<16x64xf32>
    tpu.vector_store %arg7[%c0_6, %c0_7], %7 {strides = array<i32>} : memref<16x64xf32, #tpu.memory_space<vmem>>, vector<16x64xf32>,
    %c0_i32_8 = arith.constant 0 : i32
    %9 = arith.cmpi eq, %arg2, %c0_i32_8 : i32
    %10 = arith.extui %9 : i1 to i32
    %c0_i32_9 = arith.constant 0 : i32
    %11 = arith.cmpi ne, %10, %c0_i32_9 : i32
    scf.if %11 {
      %c0_10 = arith.constant 0 : index
      %c0_11 = arith.constant 0 : index
      %12 = vector.load %arg7[%c0_10, %c0_11] : memref<16x64xf32, #tpu.memory_space<vmem>>, vector<16x64xf32>
      %c0_12 = arith.constant 0 : index
      %c0_13 = arith.constant 0 : index
      %13 = vector.load %arg5[%c0_12, %c0_13] : memref<1x64xf32, #tpu.memory_space<vmem>>, vector<1x64xf32>
      %14 = vector.broadcast %13 : vector<1x64xf32> to vector<16x64xf32>
      %15 = arith.addf %12, %14 : vector<16x64xf32>
      %16 = arith.truncf %15 : vector<16x64xf32> to vector<16x64xbf16>
      %c0_14 = arith.constant 0 : index
      %c0_15 = arith.constant 0 : index
      %17 = vector.load %arg6[%c0_14, %c0_15] : memref<16x64xbf16, #tpu.memory_space<vmem>>, vector<16x64xbf16>
      tpu.vector_store %arg6[%c0_14, %c0_15], %16 {strides = array<i32>} : memref<16x64xbf16, #tpu.memory_space<vmem>>, vector<16x64xbf16>,
    } else {
    }
    return
  }
  func.func @transform_0(%arg0: i32, %arg1: i32, %arg2: i32) -> (i32, i32) {
    %c0_i32 = arith.constant 0 : i32
    return %arg0, %arg2 : i32, i32
  }
  func.func @transform_1(%arg0: i32, %arg1: i32, %arg2: i32) -> (i32, i32) {
    %c0_i32 = arith.constant 0 : i32
    return %arg2, %arg1 : i32, i32
  }
  func.func @transform_2(%arg0: i32, %arg1: i32, %arg2: i32) -> (i32, i32) {
    %c0_i32 = arith.constant 0 : i32
    %c0_i32_0 = arith.constant 0 : i32
    return %c0_i32, %arg1 : i32, i32
  }
  func.func @transform_3(%arg0: i32, %arg1: i32, %arg2: i32) -> (i32, i32) {
    %c0_i32 = arith.constant 0 : i32
    return %arg0, %arg1 : i32, i32
  }
}

module attributes {stable_mosaic.version = 11 : i64} {
  func.func @_ffn_res_ln_kernel(%arg0: i32, %arg1: i32, %arg2: memref<16x32xbf16, #tpu.memory_space<vmem>>, %arg3: memref<32x64xbf16, #tpu.memory_space<vmem>>, %arg4: memref<1x64xf32, #tpu.memory_space<vmem>>, %arg5: memref<64x32xbf16, #tpu.memory_space<vmem>>, %arg6: memref<1x32xf32, #tpu.memory_space<vmem>>, %arg7: memref<1x32xf32, #tpu.memory_space<vmem>>, %arg8: memref<1x32xf32, #tpu.memory_space<vmem>>, %arg9: memref<16x32xbf16, #tpu.memory_space<vmem>>, %arg10: memref<16x32xf32, #tpu.memory_space<vmem>>) attributes {dimension_semantics = [#tpu.dimension_semantics<parallel>, #tpu.dimension_semantics<arbitrary>], iteration_bounds = array<i64: 1, 1>, scalar_prefetch = 0 : i64, scratch_operands = 1 : i64, tpu.core_type = #tpu.core_type<tc>, window_params = [{transform_indices = @transform_0, window_bounds = array<i64: 16, 32>}, {transform_indices = @transform_1, window_bounds = array<i64: 32, 64>}, {transform_indices = @transform_2, window_bounds = array<i64: 1, 64>}, {transform_indices = @transform_3, window_bounds = array<i64: 64, 32>}, {pipeline_mode = #tpu.pipeline_mode<synchronous>, transform_indices = @transform_4, window_bounds = array<i64: 1, 32>}, {pipeline_mode = #tpu.pipeline_mode<synchronous>, transform_indices = @transform_5, window_bounds = array<i64: 1, 32>}, {pipeline_mode = #tpu.pipeline_mode<synchronous>, transform_indices = @transform_6, window_bounds = array<i64: 1, 32>}, {transform_indices = @transform_7, window_bounds = array<i64: 16, 32>}]} {
    %c0_i32 = arith.constant 0 : i32
    %0 = arith.cmpi eq, %arg1, %c0_i32 : i32
    %1 = arith.extui %0 : i1 to i32
    %c0_i32_0 = arith.constant 0 : i32
    %2 = arith.cmpi ne, %1, %c0_i32_0 : i32
    scf.if %2 {
      %cst_16 = arith.constant 0.000000e+00 : f32
      %20 = vector.broadcast %cst_16 : f32 to vector<16x32xf32>
      %c0_17 = arith.constant 0 : index
      %c0_18 = arith.constant 0 : index
      %21 = vector.load %arg10[%c0_17, %c0_18] : memref<16x32xf32, #tpu.memory_space<vmem>>, vector<16x32xf32>
      tpu.vector_store %arg10[%c0_17, %c0_18], %20 {strides = array<i32>} : memref<16x32xf32, #tpu.memory_space<vmem>>, vector<16x32xf32>,
    } else {
    }
    %c0 = arith.constant 0 : index
    %c0_1 = arith.constant 0 : index
    %3 = vector.load %arg2[%c0, %c0_1] : memref<16x32xbf16, #tpu.memory_space<vmem>>, vector<16x32xbf16>
    %c0_2 = arith.constant 0 : index
    %c0_3 = arith.constant 0 : index
    %4 = vector.load %arg3[%c0_2, %c0_3] : memref<32x64xbf16, #tpu.memory_space<vmem>>, vector<32x64xbf16>
    %cst = arith.constant dense<0.000000e+00> : vector<16x64xf32>
    %5 = tpu.matmul %3, %4, %cst {dimension_numbers = #tpu.dot_dimension_numbers<[1], [0], [0], [1], [0, 0, 1, 1], [], []>} : vector<16x32xbf16>, vector<32x64xbf16>, vector<16x64xf32> -> vector<16x64xf32>
    %c0_4 = arith.constant 0 : index
    %c0_5 = arith.constant 0 : index
    %6 = vector.load %arg4[%c0_4, %c0_5] : memref<1x64xf32, #tpu.memory_space<vmem>>, vector<1x64xf32>
    %7 = vector.broadcast %6 : vector<1x64xf32> to vector<16x64xf32>
    %8 = arith.addf %5, %7 : vector<16x64xf32>
    %cst_6 = arith.constant 0.000000e+00 : f32
    %9 = vector.broadcast %cst_6 : f32 to vector<16x64xf32>
    %10 = arith.maximumf %8, %9 : vector<16x64xf32>
    %c0_7 = arith.constant 0 : index
    %c0_8 = arith.constant 0 : index
    %11 = vector.load %arg10[%c0_7, %c0_8] : memref<16x32xf32, #tpu.memory_space<vmem>>, vector<16x32xf32>
    %12 = arith.truncf %10 : vector<16x64xf32> to vector<16x64xbf16>
    %c0_9 = arith.constant 0 : index
    %c0_10 = arith.constant 0 : index
    %13 = vector.load %arg5[%c0_9, %c0_10] : memref<64x32xbf16, #tpu.memory_space<vmem>>, vector<64x32xbf16>
    %cst_11 = arith.constant dense<0.000000e+00> : vector<16x32xf32>
    %14 = tpu.matmul %12, %13, %cst_11 {dimension_numbers = #tpu.dot_dimension_numbers<[1], [0], [0], [1], [0, 0, 1, 1], [], []>} : vector<16x64xbf16>, vector<64x32xbf16>, vector<16x32xf32> -> vector<16x32xf32>
    %15 = arith.addf %11, %14 : vector<16x32xf32>
    %c0_12 = arith.constant 0 : index
    %c0_13 = arith.constant 0 : index
    %16 = vector.load %arg10[%c0_12, %c0_13] : memref<16x32xf32, #tpu.memory_space<vmem>>, vector<16x32xf32>
    tpu.vector_store %arg10[%c0_12, %c0_13], %15 {strides = array<i32>} : memref<16x32xf32, #tpu.memory_space<vmem>>, vector<16x32xf32>,
    %c0_i32_14 = arith.constant 0 : i32
    %17 = arith.cmpi eq, %arg1, %c0_i32_14 : i32
    %18 = arith.extui %17 : i1 to i32
    %c0_i32_15 = arith.constant 0 : i32
    %19 = arith.cmpi ne, %18, %c0_i32_15 : i32
    scf.if %19 {
      %c0_16 = arith.constant 0 : index
      %c0_17 = arith.constant 0 : index
      %20 = vector.load %arg10[%c0_16, %c0_17] : memref<16x32xf32, #tpu.memory_space<vmem>>, vector<16x32xf32>
      %c0_18 = arith.constant 0 : index
      %c0_19 = arith.constant 0 : index
      %21 = vector.load %arg6[%c0_18, %c0_19] : memref<1x32xf32, #tpu.memory_space<vmem>>, vector<1x32xf32>
      %22 = vector.broadcast %21 : vector<1x32xf32> to vector<16x32xf32>
      %23 = arith.addf %20, %22 : vector<16x32xf32>
      %c0_20 = arith.constant 0 : index
      %c0_21 = arith.constant 0 : index
      %24 = vector.load %arg2[%c0_20, %c0_21] : memref<16x32xbf16, #tpu.memory_space<vmem>>, vector<16x32xbf16>
      %25 = arith.extf %24 : vector<16x32xbf16> to vector<16x32xf32>
      %26 = arith.addf %23, %25 : vector<16x32xf32>
      %cst_22 = arith.constant dense<0.000000e+00> : vector<16xf32>
      %27 = vector.multi_reduction <add>, %26, %cst_22 [1] : vector<16x32xf32> to vector<16xf32>
      %28 = vector.shape_cast %27 : vector<16xf32> to vector<16x1xf32>
      %cst_23 = arith.constant 3.200000e+01 : f32
      %29 = vector.broadcast %cst_23 : f32 to vector<16x1xf32>
      %30 = arith.divf %28, %29 : vector<16x1xf32>
      %31 = vector.broadcast %30 : vector<16x1xf32> to vector<16x32xf32>
      %32 = arith.subf %26, %31 : vector<16x32xf32>
      %33 = arith.mulf %32, %32 : vector<16x32xf32>
      %cst_24 = arith.constant dense<0.000000e+00> : vector<16xf32>
      %34 = vector.multi_reduction <add>, %33, %cst_24 [1] : vector<16x32xf32> to vector<16xf32>
      %35 = vector.shape_cast %34 : vector<16xf32> to vector<16x1xf32>
      %cst_25 = arith.constant 3.200000e+01 : f32
      %36 = vector.broadcast %cst_25 : f32 to vector<16x1xf32>
      %37 = arith.divf %35, %36 : vector<16x1xf32>
      %38 = vector.broadcast %30 : vector<16x1xf32> to vector<16x32xf32>
      %39 = arith.subf %26, %38 : vector<16x32xf32>
      %cst_26 = arith.constant 9.99999974E-6 : f32
      %40 = vector.broadcast %cst_26 : f32 to vector<16x1xf32>
      %41 = arith.addf %37, %40 : vector<16x1xf32>
      %42 = math.rsqrt %41 : vector<16x1xf32>
      %43 = vector.broadcast %42 : vector<16x1xf32> to vector<16x32xf32>
      %44 = arith.mulf %39, %43 : vector<16x32xf32>
      %c0_27 = arith.constant 0 : index
      %c0_28 = arith.constant 0 : index
      %45 = vector.load %arg7[%c0_27, %c0_28] : memref<1x32xf32, #tpu.memory_space<vmem>>, vector<1x32xf32>
      %46 = vector.broadcast %45 : vector<1x32xf32> to vector<16x32xf32>
      %47 = arith.mulf %44, %46 : vector<16x32xf32>
      %c0_29 = arith.constant 0 : index
      %c0_30 = arith.constant 0 : index
      %48 = vector.load %arg8[%c0_29, %c0_30] : memref<1x32xf32, #tpu.memory_space<vmem>>, vector<1x32xf32>
      %49 = vector.broadcast %48 : vector<1x32xf32> to vector<16x32xf32>
      %50 = arith.addf %47, %49 : vector<16x32xf32>
      %51 = arith.truncf %50 : vector<16x32xf32> to vector<16x32xbf16>
      %c0_31 = arith.constant 0 : index
      %c0_32 = arith.constant 0 : index
      %52 = vector.load %arg9[%c0_31, %c0_32] : memref<16x32xbf16, #tpu.memory_space<vmem>>, vector<16x32xbf16>
      tpu.vector_store %arg9[%c0_31, %c0_32], %51 {strides = array<i32>} : memref<16x32xbf16, #tpu.memory_space<vmem>>, vector<16x32xbf16>,
    } else {
    }
    return
  }
  func.func @transform_0(%arg0: i32, %arg1: i32) -> (i32, i32) {
    %c0_i32 = arith.constant 0 : i32
    %c0_i32_0 = arith.constant 0 : i32
    return %arg0, %c0_i32 : i32, i32
  }
  func.func @transform_1(%arg0: i32, %arg1: i32) -> (i32, i32) {
    %c0_i32 = arith.constant 0 : i32
    %c0_i32_0 = arith.constant 0 : i32
    return %c0_i32, %arg1 : i32, i32
  }
  func.func @transform_2(%arg0: i32, %arg1: i32) -> (i32, i32) {
    %c0_i32 = arith.constant 0 : i32
    %c0_i32_0 = arith.constant 0 : i32
    return %c0_i32, %arg1 : i32, i32
  }
  func.func @transform_3(%arg0: i32, %arg1: i32) -> (i32, i32) {
    %c0_i32 = arith.constant 0 : i32
    %c0_i32_0 = arith.constant 0 : i32
    return %arg1, %c0_i32 : i32, i32
  }
  func.func @transform_4(%arg0: i32, %arg1: i32) -> (i32, i32) {
    %c0_i32 = arith.constant 0 : i32
    %c0_i32_0 = arith.constant 0 : i32
    %c0_i32_1 = arith.constant 0 : i32
    return %c0_i32, %c0_i32_0 : i32, i32
  }
  func.func @transform_5(%arg0: i32, %arg1: i32) -> (i32, i32) {
    %c0_i32 = arith.constant 0 : i32
    %c0_i32_0 = arith.constant 0 : i32
    %c0_i32_1 = arith.constant 0 : i32
    return %c0_i32, %c0_i32_0 : i32, i32
  }
  func.func @transform_6(%arg0: i32, %arg1: i32) -> (i32, i32) {
    %c0_i32 = arith.constant 0 : i32
    %c0_i32_0 = arith.constant 0 : i32
    %c0_i32_1 = arith.constant 0 : i32
    return %c0_i32, %c0_i32_0 : i32, i32
  }
  func.func @transform_7(%arg0: i32, %arg1: i32) -> (i32, i32) {
    %c0_i32 = arith.constant 0 : i32
    %c0_i32_0 = arith.constant 0 : i32
    return %arg0, %c0_i32 : i32, i32
  }
}

module attributes {stable_mosaic.version = 11 : i64} {
  func.func @_attn_kernel(%arg0: i32, %arg1: i32, %arg2: memref<1x8x96xbf16, #tpu.memory_space<vmem>>, %arg3: memref<1x8x96xbf16, #tpu.memory_space<vmem>>, %arg4: memref<1x8x32xbf16, #tpu.memory_space<vmem>>) attributes {dimension_semantics = [#tpu.dimension_semantics<parallel>, #tpu.dimension_semantics<parallel>], iteration_bounds = array<i64: 2, 1>, scalar_prefetch = 0 : i64, scratch_operands = 0 : i64, tpu.core_type = #tpu.core_type<tc>, window_params = [{transform_indices = @transform_0, window_bounds = array<i64: 1, 8, 96>}, {transform_indices = @transform_1, window_bounds = array<i64: 1, 8, 96>}, {transform_indices = @transform_2, window_bounds = array<i64: 1, 8, 32>}]} {
    %c0 = arith.constant 0 : index
    %c0_0 = arith.constant 0 : index
    %c0_1 = arith.constant 0 : index
    %0 = vector.load %arg2[%c0, %c0_0, %c0_1] : memref<1x8x96xbf16, #tpu.memory_space<vmem>>, vector<1x8x96xbf16>
    %1 = vector.shape_cast %0 : vector<1x8x96xbf16> to vector<8x96xbf16>
    %c0_2 = arith.constant 0 : index
    %c0_3 = arith.constant 0 : index
    %c0_4 = arith.constant 0 : index
    %2 = vector.load %arg3[%c0_2, %c0_3, %c0_4] : memref<1x8x96xbf16, #tpu.memory_space<vmem>>, vector<1x8x96xbf16>
    %3 = vector.shape_cast %2 : vector<1x8x96xbf16> to vector<8x96xbf16>
    %4 = tpu.iota {dimensions = array<i32: 0>} : vector<8x8xi32>
    %c8_i32 = arith.constant 8 : i32
    %5 = arith.muli %arg1, %c8_i32 : i32
    %6 = vector.broadcast %5 : i32 to vector<8x8xi32>
    %7 = arith.addi %4, %6 : vector<8x8xi32>
    %8 = tpu.iota {dimensions = array<i32: 1>} : vector<8x8xi32>
    %9 = arith.cmpi sle, %8, %7 : vector<8x8xi32>
    %cst = arith.constant 0.000000e+00 : f32
    %cst_5 = arith.constant -1.000000e+30 : f32
    %10 = vector.broadcast %cst : f32 to vector<8x8xf32>
    %11 = vector.broadcast %cst_5 : f32 to vector<8x8xf32>
    %12 = arith.select %9, %10, %11 : vector<8x8xi1>, vector<8x8xf32>
    %13 = vector.extract_strided_slice %1 {offsets = [0, 0], sizes = [8, 8], strides = [1, 1]} : vector<8x96xbf16> to vector<8x8xbf16>
    %14 = vector.extract_strided_slice %3 {offsets = [0, 32], sizes = [8, 8], strides = [1, 1]} : vector<8x96xbf16> to vector<8x8xbf16>
    %15 = vector.extract_strided_slice %3 {offsets = [0, 64], sizes = [8, 8], strides = [1, 1]} : vector<8x96xbf16> to vector<8x8xbf16>
    %cst_6 = arith.constant dense<0.000000e+00> : vector<8x8xf32>
    %16 = tpu.matmul %13, %14, %cst_6 {dimension_numbers = #tpu.dot_dimension_numbers<[1], [1], [0], [0], [0, 0, 1, 0], [], []>} : vector<8x8xbf16>, vector<8x8xbf16>, vector<8x8xf32> -> vector<8x8xf32>
    %cst_7 = arith.constant 0.353553385 : f32
    %17 = vector.broadcast %cst_7 : f32 to vector<8x8xf32>
    %18 = arith.mulf %16, %17 : vector<8x8xf32>
    %19 = arith.addf %18, %12 : vector<8x8xf32>
    %cst_8 = arith.constant dense<0xFF800000> : vector<8xf32>
    %20 = vector.multi_reduction <maximumf>, %19, %cst_8 [1] : vector<8x8xf32> to vector<8xf32>
    %21 = vector.shape_cast %20 : vector<8xf32> to vector<8x1xf32>
    %22 = vector.broadcast %21 : vector<8x1xf32> to vector<8x8xf32>
    %23 = arith.subf %19, %22 : vector<8x8xf32>
    %24 = math.exp %23 : vector<8x8xf32>
    %cst_9 = arith.constant dense<0.000000e+00> : vector<8xf32>
    %25 = vector.multi_reduction <add>, %24, %cst_9 [1] : vector<8x8xf32> to vector<8xf32>
    %26 = vector.shape_cast %25 : vector<8xf32> to vector<8x1xf32>
    %27 = tpu.reciprocal %26 {approx = true} : vector<8x1xf32> -> vector<8x1xf32>
    %28 = vector.broadcast %27 : vector<8x1xf32> to vector<8x8xf32>
    %29 = arith.mulf %24, %28 : vector<8x8xf32>
    %30 = arith.truncf %29 : vector<8x8xf32> to vector<8x8xbf16>
    %cst_10 = arith.constant dense<0.000000e+00> : vector<8x8xf32>
    %31 = tpu.matmul %30, %15, %cst_10 {dimension_numbers = #tpu.dot_dimension_numbers<[1], [0], [0], [1], [0, 0, 1, 1], [], []>} : vector<8x8xbf16>, vector<8x8xbf16>, vector<8x8xf32> -> vector<8x8xf32>
    %32 = vector.extract_strided_slice %1 {offsets = [0, 8], sizes = [8, 8], strides = [1, 1]} : vector<8x96xbf16> to vector<8x8xbf16>
    %33 = vector.extract_strided_slice %3 {offsets = [0, 40], sizes = [8, 8], strides = [1, 1]} : vector<8x96xbf16> to vector<8x8xbf16>
    %34 = vector.extract_strided_slice %3 {offsets = [0, 72], sizes = [8, 8], strides = [1, 1]} : vector<8x96xbf16> to vector<8x8xbf16>
    %cst_11 = arith.constant dense<0.000000e+00> : vector<8x8xf32>
    %35 = tpu.matmul %32, %33, %cst_11 {dimension_numbers = #tpu.dot_dimension_numbers<[1], [1], [0], [0], [0, 0, 1, 0], [], []>} : vector<8x8xbf16>, vector<8x8xbf16>, vector<8x8xf32> -> vector<8x8xf32>
    %cst_12 = arith.constant 0.353553385 : f32
    %36 = vector.broadcast %cst_12 : f32 to vector<8x8xf32>
    %37 = arith.mulf %35, %36 : vector<8x8xf32>
    %38 = arith.addf %37, %12 : vector<8x8xf32>
    %cst_13 = arith.constant dense<0xFF800000> : vector<8xf32>
    %39 = vector.multi_reduction <maximumf>, %38, %cst_13 [1] : vector<8x8xf32> to vector<8xf32>
    %40 = vector.shape_cast %39 : vector<8xf32> to vector<8x1xf32>
    %41 = vector.broadcast %40 : vector<8x1xf32> to vector<8x8xf32>
    %42 = arith.subf %38, %41 : vector<8x8xf32>
    %43 = math.exp %42 : vector<8x8xf32>
    %cst_14 = arith.constant dense<0.000000e+00> : vector<8xf32>
    %44 = vector.multi_reduction <add>, %43, %cst_14 [1] : vector<8x8xf32> to vector<8xf32>
    %45 = vector.shape_cast %44 : vector<8xf32> to vector<8x1xf32>
    %46 = tpu.reciprocal %45 {approx = true} : vector<8x1xf32> -> vector<8x1xf32>
    %47 = vector.broadcast %46 : vector<8x1xf32> to vector<8x8xf32>
    %48 = arith.mulf %43, %47 : vector<8x8xf32>
    %49 = arith.truncf %48 : vector<8x8xf32> to vector<8x8xbf16>
    %cst_15 = arith.constant dense<0.000000e+00> : vector<8x8xf32>
    %50 = tpu.matmul %49, %34, %cst_15 {dimension_numbers = #tpu.dot_dimension_numbers<[1], [0], [0], [1], [0, 0, 1, 1], [], []>} : vector<8x8xbf16>, vector<8x8xbf16>, vector<8x8xf32> -> vector<8x8xf32>
    %51 = vector.extract_strided_slice %1 {offsets = [0, 16], sizes = [8, 8], strides = [1, 1]} : vector<8x96xbf16> to vector<8x8xbf16>
    %52 = vector.extract_strided_slice %3 {offsets = [0, 48], sizes = [8, 8], strides = [1, 1]} : vector<8x96xbf16> to vector<8x8xbf16>
    %53 = vector.extract_strided_slice %3 {offsets = [0, 80], sizes = [8, 8], strides = [1, 1]} : vector<8x96xbf16> to vector<8x8xbf16>
    %cst_16 = arith.constant dense<0.000000e+00> : vector<8x8xf32>
    %54 = tpu.matmul %51, %52, %cst_16 {dimension_numbers = #tpu.dot_dimension_numbers<[1], [1], [0], [0], [0, 0, 1, 0], [], []>} : vector<8x8xbf16>, vector<8x8xbf16>, vector<8x8xf32> -> vector<8x8xf32>
    %cst_17 = arith.constant 0.353553385 : f32
    %55 = vector.broadcast %cst_17 : f32 to vector<8x8xf32>
    %56 = arith.mulf %54, %55 : vector<8x8xf32>
    %57 = arith.addf %56, %12 : vector<8x8xf32>
    %cst_18 = arith.constant dense<0xFF800000> : vector<8xf32>
    %58 = vector.multi_reduction <maximumf>, %57, %cst_18 [1] : vector<8x8xf32> to vector<8xf32>
    %59 = vector.shape_cast %58 : vector<8xf32> to vector<8x1xf32>
    %60 = vector.broadcast %59 : vector<8x1xf32> to vector<8x8xf32>
    %61 = arith.subf %57, %60 : vector<8x8xf32>
    %62 = math.exp %61 : vector<8x8xf32>
    %cst_19 = arith.constant dense<0.000000e+00> : vector<8xf32>
    %63 = vector.multi_reduction <add>, %62, %cst_19 [1] : vector<8x8xf32> to vector<8xf32>
    %64 = vector.shape_cast %63 : vector<8xf32> to vector<8x1xf32>
    %65 = tpu.reciprocal %64 {approx = true} : vector<8x1xf32> -> vector<8x1xf32>
    %66 = vector.broadcast %65 : vector<8x1xf32> to vector<8x8xf32>
    %67 = arith.mulf %62, %66 : vector<8x8xf32>
    %68 = arith.truncf %67 : vector<8x8xf32> to vector<8x8xbf16>
    %cst_20 = arith.constant dense<0.000000e+00> : vector<8x8xf32>
    %69 = tpu.matmul %68, %53, %cst_20 {dimension_numbers = #tpu.dot_dimension_numbers<[1], [0], [0], [1], [0, 0, 1, 1], [], []>} : vector<8x8xbf16>, vector<8x8xbf16>, vector<8x8xf32> -> vector<8x8xf32>
    %70 = vector.extract_strided_slice %1 {offsets = [0, 24], sizes = [8, 8], strides = [1, 1]} : vector<8x96xbf16> to vector<8x8xbf16>
    %71 = vector.extract_strided_slice %3 {offsets = [0, 56], sizes = [8, 8], strides = [1, 1]} : vector<8x96xbf16> to vector<8x8xbf16>
    %72 = vector.extract_strided_slice %3 {offsets = [0, 88], sizes = [8, 8], strides = [1, 1]} : vector<8x96xbf16> to vector<8x8xbf16>
    %cst_21 = arith.constant dense<0.000000e+00> : vector<8x8xf32>
    %73 = tpu.matmul %70, %71, %cst_21 {dimension_numbers = #tpu.dot_dimension_numbers<[1], [1], [0], [0], [0, 0, 1, 0], [], []>} : vector<8x8xbf16>, vector<8x8xbf16>, vector<8x8xf32> -> vector<8x8xf32>
    %cst_22 = arith.constant 0.353553385 : f32
    %74 = vector.broadcast %cst_22 : f32 to vector<8x8xf32>
    %75 = arith.mulf %73, %74 : vector<8x8xf32>
    %76 = arith.addf %75, %12 : vector<8x8xf32>
    %cst_23 = arith.constant dense<0xFF800000> : vector<8xf32>
    %77 = vector.multi_reduction <maximumf>, %76, %cst_23 [1] : vector<8x8xf32> to vector<8xf32>
    %78 = vector.shape_cast %77 : vector<8xf32> to vector<8x1xf32>
    %79 = vector.broadcast %78 : vector<8x1xf32> to vector<8x8xf32>
    %80 = arith.subf %76, %79 : vector<8x8xf32>
    %81 = math.exp %80 : vector<8x8xf32>
    %cst_24 = arith.constant dense<0.000000e+00> : vector<8xf32>
    %82 = vector.multi_reduction <add>, %81, %cst_24 [1] : vector<8x8xf32> to vector<8xf32>
    %83 = vector.shape_cast %82 : vector<8xf32> to vector<8x1xf32>
    %84 = tpu.reciprocal %83 {approx = true} : vector<8x1xf32> -> vector<8x1xf32>
    %85 = vector.broadcast %84 : vector<8x1xf32> to vector<8x8xf32>
    %86 = arith.mulf %81, %85 : vector<8x8xf32>
    %87 = arith.truncf %86 : vector<8x8xf32> to vector<8x8xbf16>
    %cst_25 = arith.constant dense<0.000000e+00> : vector<8x8xf32>
    %88 = tpu.matmul %87, %72, %cst_25 {dimension_numbers = #tpu.dot_dimension_numbers<[1], [0], [0], [1], [0, 0, 1, 1], [], []>} : vector<8x8xbf16>, vector<8x8xbf16>, vector<8x8xf32> -> vector<8x8xf32>
    %89 = tpu.concatenate %31, %50, %69, %88 in 1 : vector<8x8xf32>, vector<8x8xf32>, vector<8x8xf32>, vector<8x8xf32> -> vector<8x32xf32>
    %90 = arith.truncf %89 : vector<8x32xf32> to vector<8x32xbf16>
    %c0_26 = arith.constant 0 : index
    %c0_27 = arith.constant 0 : index
    %c0_28 = arith.constant 0 : index
    %91 = vector.load %arg4[%c0_26, %c0_27, %c0_28] : memref<1x8x32xbf16, #tpu.memory_space<vmem>>, vector<1x8x32xbf16>
    %92 = vector.shape_cast %91 : vector<1x8x32xbf16> to vector<8x32xbf16>
    %93 = vector.shape_cast %90 : vector<8x32xbf16> to vector<1x8x32xbf16>
    tpu.vector_store %arg4[%c0_26, %c0_27, %c0_28], %93 {strides = array<i32>} : memref<1x8x32xbf16, #tpu.memory_space<vmem>>, vector<1x8x32xbf16>,
    return
  }
  func.func @transform_0(%arg0: i32, %arg1: i32) -> (i32, i32, i32) {
    %c0_i32 = arith.constant 0 : i32
    %c0_i32_0 = arith.constant 0 : i32
    return %arg0, %arg1, %c0_i32 : i32, i32, i32
  }
  func.func @transform_1(%arg0: i32, %arg1: i32) -> (i32, i32, i32) {
    %c0_i32 = arith.constant 0 : i32
    %c0_i32_0 = arith.constant 0 : i32
    %c0_i32_1 = arith.constant 0 : i32
    return %arg0, %c0_i32, %c0_i32_0 : i32, i32, i32
  }
  func.func @transform_2(%arg0: i32, %arg1: i32) -> (i32, i32, i32) {
    %c0_i32 = arith.constant 0 : i32
    %c0_i32_0 = arith.constant 0 : i32
    return %arg0, %arg1, %c0_i32 : i32, i32, i32
  }
}

module attributes {stable_mosaic.version = 11 : i64} {
  func.func @_linear_kernel(%arg0: i32, %arg1: i32, %arg2: i32, %arg3: memref<16x32xbf16, #tpu.memory_space<vmem>>, %arg4: memref<32x32xbf16, #tpu.memory_space<vmem>>, %arg5: memref<1x32xf32, #tpu.memory_space<vmem>>, %arg6: memref<16x32xbf16, #tpu.memory_space<vmem>>, %arg7: memref<16x32xf32, #tpu.memory_space<vmem>>) attributes {dimension_semantics = [#tpu.dimension_semantics<parallel>, #tpu.dimension_semantics<parallel>, #tpu.dimension_semantics<arbitrary>], iteration_bounds = array<i64: 1, 1, 1>, scalar_prefetch = 0 : i64, scratch_operands = 1 : i64, tpu.core_type = #tpu.core_type<tc>, window_params = [{transform_indices = @transform_0, window_bounds = array<i64: 16, 32>}, {transform_indices = @transform_1, window_bounds = array<i64: 32, 32>}, {transform_indices = @transform_2, window_bounds = array<i64: 1, 32>}, {transform_indices = @transform_3, window_bounds = array<i64: 16, 32>}]} {
    %c0_i32 = arith.constant 0 : i32
    %0 = arith.cmpi eq, %arg2, %c0_i32 : i32
    %1 = arith.extui %0 : i1 to i32
    %c0_i32_0 = arith.constant 0 : i32
    %2 = arith.cmpi ne, %1, %c0_i32_0 : i32
    scf.if %2 {
      %cst_10 = arith.constant 0.000000e+00 : f32
      %12 = vector.broadcast %cst_10 : f32 to vector<16x32xf32>
      %c0_11 = arith.constant 0 : index
      %c0_12 = arith.constant 0 : index
      %13 = vector.load %arg7[%c0_11, %c0_12] : memref<16x32xf32, #tpu.memory_space<vmem>>, vector<16x32xf32>
      tpu.vector_store %arg7[%c0_11, %c0_12], %12 {strides = array<i32>} : memref<16x32xf32, #tpu.memory_space<vmem>>, vector<16x32xf32>,
    } else {
    }
    %c0 = arith.constant 0 : index
    %c0_1 = arith.constant 0 : index
    %3 = vector.load %arg7[%c0, %c0_1] : memref<16x32xf32, #tpu.memory_space<vmem>>, vector<16x32xf32>
    %c0_2 = arith.constant 0 : index
    %c0_3 = arith.constant 0 : index
    %4 = vector.load %arg3[%c0_2, %c0_3] : memref<16x32xbf16, #tpu.memory_space<vmem>>, vector<16x32xbf16>
    %c0_4 = arith.constant 0 : index
    %c0_5 = arith.constant 0 : index
    %5 = vector.load %arg4[%c0_4, %c0_5] : memref<32x32xbf16, #tpu.memory_space<vmem>>, vector<32x32xbf16>
    %cst = arith.constant dense<0.000000e+00> : vector<16x32xf32>
    %6 = tpu.matmul %4, %5, %cst {dimension_numbers = #tpu.dot_dimension_numbers<[1], [0], [0], [1], [0, 0, 1, 1], [], []>} : vector<16x32xbf16>, vector<32x32xbf16>, vector<16x32xf32> -> vector<16x32xf32>
    %7 = arith.addf %3, %6 : vector<16x32xf32>
    %c0_6 = arith.constant 0 : index
    %c0_7 = arith.constant 0 : index
    %8 = vector.load %arg7[%c0_6, %c0_7] : memref<16x32xf32, #tpu.memory_space<vmem>>, vector<16x32xf32>
    tpu.vector_store %arg7[%c0_6, %c0_7], %7 {strides = array<i32>} : memref<16x32xf32, #tpu.memory_space<vmem>>, vector<16x32xf32>,
    %c0_i32_8 = arith.constant 0 : i32
    %9 = arith.cmpi eq, %arg2, %c0_i32_8 : i32
    %10 = arith.extui %9 : i1 to i32
    %c0_i32_9 = arith.constant 0 : i32
    %11 = arith.cmpi ne, %10, %c0_i32_9 : i32
    scf.if %11 {
      %c0_10 = arith.constant 0 : index
      %c0_11 = arith.constant 0 : index
      %12 = vector.load %arg7[%c0_10, %c0_11] : memref<16x32xf32, #tpu.memory_space<vmem>>, vector<16x32xf32>
      %c0_12 = arith.constant 0 : index
      %c0_13 = arith.constant 0 : index
      %13 = vector.load %arg5[%c0_12, %c0_13] : memref<1x32xf32, #tpu.memory_space<vmem>>, vector<1x32xf32>
      %14 = vector.broadcast %13 : vector<1x32xf32> to vector<16x32xf32>
      %15 = arith.addf %12, %14 : vector<16x32xf32>
      %16 = arith.truncf %15 : vector<16x32xf32> to vector<16x32xbf16>
      %c0_14 = arith.constant 0 : index
      %c0_15 = arith.constant 0 : index
      %17 = vector.load %arg6[%c0_14, %c0_15] : memref<16x32xbf16, #tpu.memory_space<vmem>>, vector<16x32xbf16>
      tpu.vector_store %arg6[%c0_14, %c0_15], %16 {strides = array<i32>} : memref<16x32xbf16, #tpu.memory_space<vmem>>, vector<16x32xbf16>,
    } else {
    }
    return
  }
  func.func @transform_0(%arg0: i32, %arg1: i32, %arg2: i32) -> (i32, i32) {
    %c0_i32 = arith.constant 0 : i32
    return %arg0, %arg2 : i32, i32
  }
  func.func @transform_1(%arg0: i32, %arg1: i32, %arg2: i32) -> (i32, i32) {
    %c0_i32 = arith.constant 0 : i32
    return %arg2, %arg1 : i32, i32
  }
  func.func @transform_2(%arg0: i32, %arg1: i32, %arg2: i32) -> (i32, i32) {
    %c0_i32 = arith.constant 0 : i32
    %c0_i32_0 = arith.constant 0 : i32
    return %c0_i32, %arg1 : i32, i32
  }
  func.func @transform_3(%arg0: i32, %arg1: i32, %arg2: i32) -> (i32, i32) {
    %c0_i32 = arith.constant 0 : i32
    return %arg0, %arg1 : i32, i32
  }
}

module attributes {stable_mosaic.version = 11 : i64} {
  func.func @_attn_kernel(%arg0: i32, %arg1: i32, %arg2: memref<1x8x32xbf16, #tpu.memory_space<vmem>>, %arg3: memref<1x8x64xbf16, #tpu.memory_space<vmem>>, %arg4: memref<1x8x32xbf16, #tpu.memory_space<vmem>>) attributes {dimension_semantics = [#tpu.dimension_semantics<parallel>, #tpu.dimension_semantics<parallel>], iteration_bounds = array<i64: 2, 1>, scalar_prefetch = 0 : i64, scratch_operands = 0 : i64, tpu.core_type = #tpu.core_type<tc>, window_params = [{transform_indices = @transform_0, window_bounds = array<i64: 1, 8, 32>}, {transform_indices = @transform_1, window_bounds = array<i64: 1, 8, 64>}, {transform_indices = @transform_2, window_bounds = array<i64: 1, 8, 32>}]} {
    %c0 = arith.constant 0 : index
    %c0_0 = arith.constant 0 : index
    %c0_1 = arith.constant 0 : index
    %0 = vector.load %arg2[%c0, %c0_0, %c0_1] : memref<1x8x32xbf16, #tpu.memory_space<vmem>>, vector<1x8x32xbf16>
    %1 = vector.shape_cast %0 : vector<1x8x32xbf16> to vector<8x32xbf16>
    %c0_2 = arith.constant 0 : index
    %c0_3 = arith.constant 0 : index
    %c0_4 = arith.constant 0 : index
    %2 = vector.load %arg3[%c0_2, %c0_3, %c0_4] : memref<1x8x64xbf16, #tpu.memory_space<vmem>>, vector<1x8x64xbf16>
    %3 = vector.shape_cast %2 : vector<1x8x64xbf16> to vector<8x64xbf16>
    %4 = vector.extract_strided_slice %1 {offsets = [0, 0], sizes = [8, 8], strides = [1, 1]} : vector<8x32xbf16> to vector<8x8xbf16>
    %5 = vector.extract_strided_slice %3 {offsets = [0, 0], sizes = [8, 8], strides = [1, 1]} : vector<8x64xbf16> to vector<8x8xbf16>
    %6 = vector.extract_strided_slice %3 {offsets = [0, 32], sizes = [8, 8], strides = [1, 1]} : vector<8x64xbf16> to vector<8x8xbf16>
    %cst = arith.constant dense<0.000000e+00> : vector<8x8xf32>
    %7 = tpu.matmul %4, %5, %cst {dimension_numbers = #tpu.dot_dimension_numbers<[1], [1], [0], [0], [0, 0, 1, 0], [], []>} : vector<8x8xbf16>, vector<8x8xbf16>, vector<8x8xf32> -> vector<8x8xf32>
    %cst_5 = arith.constant 0.353553385 : f32
    %8 = vector.broadcast %cst_5 : f32 to vector<8x8xf32>
    %9 = arith.mulf %7, %8 : vector<8x8xf32>
    %cst_6 = arith.constant dense<0xFF800000> : vector<8xf32>
    %10 = vector.multi_reduction <maximumf>, %9, %cst_6 [1] : vector<8x8xf32> to vector<8xf32>
    %11 = vector.shape_cast %10 : vector<8xf32> to vector<8x1xf32>
    %12 = vector.broadcast %11 : vector<8x1xf32> to vector<8x8xf32>
    %13 = arith.subf %9, %12 : vector<8x8xf32>
    %14 = math.exp %13 : vector<8x8xf32>
    %cst_7 = arith.constant dense<0.000000e+00> : vector<8xf32>
    %15 = vector.multi_reduction <add>, %14, %cst_7 [1] : vector<8x8xf32> to vector<8xf32>
    %16 = vector.shape_cast %15 : vector<8xf32> to vector<8x1xf32>
    %17 = tpu.reciprocal %16 {approx = true} : vector<8x1xf32> -> vector<8x1xf32>
    %18 = vector.broadcast %17 : vector<8x1xf32> to vector<8x8xf32>
    %19 = arith.mulf %14, %18 : vector<8x8xf32>
    %20 = arith.truncf %19 : vector<8x8xf32> to vector<8x8xbf16>
    %cst_8 = arith.constant dense<0.000000e+00> : vector<8x8xf32>
    %21 = tpu.matmul %20, %6, %cst_8 {dimension_numbers = #tpu.dot_dimension_numbers<[1], [0], [0], [1], [0, 0, 1, 1], [], []>} : vector<8x8xbf16>, vector<8x8xbf16>, vector<8x8xf32> -> vector<8x8xf32>
    %22 = vector.extract_strided_slice %1 {offsets = [0, 8], sizes = [8, 8], strides = [1, 1]} : vector<8x32xbf16> to vector<8x8xbf16>
    %23 = vector.extract_strided_slice %3 {offsets = [0, 8], sizes = [8, 8], strides = [1, 1]} : vector<8x64xbf16> to vector<8x8xbf16>
    %24 = vector.extract_strided_slice %3 {offsets = [0, 40], sizes = [8, 8], strides = [1, 1]} : vector<8x64xbf16> to vector<8x8xbf16>
    %cst_9 = arith.constant dense<0.000000e+00> : vector<8x8xf32>
    %25 = tpu.matmul %22, %23, %cst_9 {dimension_numbers = #tpu.dot_dimension_numbers<[1], [1], [0], [0], [0, 0, 1, 0], [], []>} : vector<8x8xbf16>, vector<8x8xbf16>, vector<8x8xf32> -> vector<8x8xf32>
    %cst_10 = arith.constant 0.353553385 : f32
    %26 = vector.broadcast %cst_10 : f32 to vector<8x8xf32>
    %27 = arith.mulf %25, %26 : vector<8x8xf32>
    %cst_11 = arith.constant dense<0xFF800000> : vector<8xf32>
    %28 = vector.multi_reduction <maximumf>, %27, %cst_11 [1] : vector<8x8xf32> to vector<8xf32>
    %29 = vector.shape_cast %28 : vector<8xf32> to vector<8x1xf32>
    %30 = vector.broadcast %29 : vector<8x1xf32> to vector<8x8xf32>
    %31 = arith.subf %27, %30 : vector<8x8xf32>
    %32 = math.exp %31 : vector<8x8xf32>
    %cst_12 = arith.constant dense<0.000000e+00> : vector<8xf32>
    %33 = vector.multi_reduction <add>, %32, %cst_12 [1] : vector<8x8xf32> to vector<8xf32>
    %34 = vector.shape_cast %33 : vector<8xf32> to vector<8x1xf32>
    %35 = tpu.reciprocal %34 {approx = true} : vector<8x1xf32> -> vector<8x1xf32>
    %36 = vector.broadcast %35 : vector<8x1xf32> to vector<8x8xf32>
    %37 = arith.mulf %32, %36 : vector<8x8xf32>
    %38 = arith.truncf %37 : vector<8x8xf32> to vector<8x8xbf16>
    %cst_13 = arith.constant dense<0.000000e+00> : vector<8x8xf32>
    %39 = tpu.matmul %38, %24, %cst_13 {dimension_numbers = #tpu.dot_dimension_numbers<[1], [0], [0], [1], [0, 0, 1, 1], [], []>} : vector<8x8xbf16>, vector<8x8xbf16>, vector<8x8xf32> -> vector<8x8xf32>
    %40 = vector.extract_strided_slice %1 {offsets = [0, 16], sizes = [8, 8], strides = [1, 1]} : vector<8x32xbf16> to vector<8x8xbf16>
    %41 = vector.extract_strided_slice %3 {offsets = [0, 16], sizes = [8, 8], strides = [1, 1]} : vector<8x64xbf16> to vector<8x8xbf16>
    %42 = vector.extract_strided_slice %3 {offsets = [0, 48], sizes = [8, 8], strides = [1, 1]} : vector<8x64xbf16> to vector<8x8xbf16>
    %cst_14 = arith.constant dense<0.000000e+00> : vector<8x8xf32>
    %43 = tpu.matmul %40, %41, %cst_14 {dimension_numbers = #tpu.dot_dimension_numbers<[1], [1], [0], [0], [0, 0, 1, 0], [], []>} : vector<8x8xbf16>, vector<8x8xbf16>, vector<8x8xf32> -> vector<8x8xf32>
    %cst_15 = arith.constant 0.353553385 : f32
    %44 = vector.broadcast %cst_15 : f32 to vector<8x8xf32>
    %45 = arith.mulf %43, %44 : vector<8x8xf32>
    %cst_16 = arith.constant dense<0xFF800000> : vector<8xf32>
    %46 = vector.multi_reduction <maximumf>, %45, %cst_16 [1] : vector<8x8xf32> to vector<8xf32>
    %47 = vector.shape_cast %46 : vector<8xf32> to vector<8x1xf32>
    %48 = vector.broadcast %47 : vector<8x1xf32> to vector<8x8xf32>
    %49 = arith.subf %45, %48 : vector<8x8xf32>
    %50 = math.exp %49 : vector<8x8xf32>
    %cst_17 = arith.constant dense<0.000000e+00> : vector<8xf32>
    %51 = vector.multi_reduction <add>, %50, %cst_17 [1] : vector<8x8xf32> to vector<8xf32>
    %52 = vector.shape_cast %51 : vector<8xf32> to vector<8x1xf32>
    %53 = tpu.reciprocal %52 {approx = true} : vector<8x1xf32> -> vector<8x1xf32>
    %54 = vector.broadcast %53 : vector<8x1xf32> to vector<8x8xf32>
    %55 = arith.mulf %50, %54 : vector<8x8xf32>
    %56 = arith.truncf %55 : vector<8x8xf32> to vector<8x8xbf16>
    %cst_18 = arith.constant dense<0.000000e+00> : vector<8x8xf32>
    %57 = tpu.matmul %56, %42, %cst_18 {dimension_numbers = #tpu.dot_dimension_numbers<[1], [0], [0], [1], [0, 0, 1, 1], [], []>} : vector<8x8xbf16>, vector<8x8xbf16>, vector<8x8xf32> -> vector<8x8xf32>
    %58 = vector.extract_strided_slice %1 {offsets = [0, 24], sizes = [8, 8], strides = [1, 1]} : vector<8x32xbf16> to vector<8x8xbf16>
    %59 = vector.extract_strided_slice %3 {offsets = [0, 24], sizes = [8, 8], strides = [1, 1]} : vector<8x64xbf16> to vector<8x8xbf16>
    %60 = vector.extract_strided_slice %3 {offsets = [0, 56], sizes = [8, 8], strides = [1, 1]} : vector<8x64xbf16> to vector<8x8xbf16>
    %cst_19 = arith.constant dense<0.000000e+00> : vector<8x8xf32>
    %61 = tpu.matmul %58, %59, %cst_19 {dimension_numbers = #tpu.dot_dimension_numbers<[1], [1], [0], [0], [0, 0, 1, 0], [], []>} : vector<8x8xbf16>, vector<8x8xbf16>, vector<8x8xf32> -> vector<8x8xf32>
    %cst_20 = arith.constant 0.353553385 : f32
    %62 = vector.broadcast %cst_20 : f32 to vector<8x8xf32>
    %63 = arith.mulf %61, %62 : vector<8x8xf32>
    %cst_21 = arith.constant dense<0xFF800000> : vector<8xf32>
    %64 = vector.multi_reduction <maximumf>, %63, %cst_21 [1] : vector<8x8xf32> to vector<8xf32>
    %65 = vector.shape_cast %64 : vector<8xf32> to vector<8x1xf32>
    %66 = vector.broadcast %65 : vector<8x1xf32> to vector<8x8xf32>
    %67 = arith.subf %63, %66 : vector<8x8xf32>
    %68 = math.exp %67 : vector<8x8xf32>
    %cst_22 = arith.constant dense<0.000000e+00> : vector<8xf32>
    %69 = vector.multi_reduction <add>, %68, %cst_22 [1] : vector<8x8xf32> to vector<8xf32>
    %70 = vector.shape_cast %69 : vector<8xf32> to vector<8x1xf32>
    %71 = tpu.reciprocal %70 {approx = true} : vector<8x1xf32> -> vector<8x1xf32>
    %72 = vector.broadcast %71 : vector<8x1xf32> to vector<8x8xf32>
    %73 = arith.mulf %68, %72 : vector<8x8xf32>
    %74 = arith.truncf %73 : vector<8x8xf32> to vector<8x8xbf16>
    %cst_23 = arith.constant dense<0.000000e+00> : vector<8x8xf32>
    %75 = tpu.matmul %74, %60, %cst_23 {dimension_numbers = #tpu.dot_dimension_numbers<[1], [0], [0], [1], [0, 0, 1, 1], [], []>} : vector<8x8xbf16>, vector<8x8xbf16>, vector<8x8xf32> -> vector<8x8xf32>
    %76 = tpu.concatenate %21, %39, %57, %75 in 1 : vector<8x8xf32>, vector<8x8xf32>, vector<8x8xf32>, vector<8x8xf32> -> vector<8x32xf32>
    %77 = arith.truncf %76 : vector<8x32xf32> to vector<8x32xbf16>
    %c0_24 = arith.constant 0 : index
    %c0_25 = arith.constant 0 : index
    %c0_26 = arith.constant 0 : index
    %78 = vector.load %arg4[%c0_24, %c0_25, %c0_26] : memref<1x8x32xbf16, #tpu.memory_space<vmem>>, vector<1x8x32xbf16>
    %79 = vector.shape_cast %78 : vector<1x8x32xbf16> to vector<8x32xbf16>
    %80 = vector.shape_cast %77 : vector<8x32xbf16> to vector<1x8x32xbf16>
    tpu.vector_store %arg4[%c0_24, %c0_25, %c0_26], %80 {strides = array<i32>} : memref<1x8x32xbf16, #tpu.memory_space<vmem>>, vector<1x8x32xbf16>,
    return
  }
  func.func @transform_0(%arg0: i32, %arg1: i32) -> (i32, i32, i32) {
    %c0_i32 = arith.constant 0 : i32
    %c0_i32_0 = arith.constant 0 : i32
    return %arg0, %arg1, %c0_i32 : i32, i32, i32
  }
  func.func @transform_1(%arg0: i32, %arg1: i32) -> (i32, i32, i32) {
    %c0_i32 = arith.constant 0 : i32
    %c0_i32_0 = arith.constant 0 : i32
    %c0_i32_1 = arith.constant 0 : i32
    return %arg0, %c0_i32, %c0_i32_0 : i32, i32, i32
  }
  func.func @transform_2(%arg0: i32, %arg1: i32) -> (i32, i32, i32) {
    %c0_i32 = arith.constant 0 : i32
    %c0_i32_0 = arith.constant 0 : i32
    return %arg0, %arg1, %c0_i32 : i32, i32, i32
  }
}

</mosaic_0001>

<bundles_post_ra>
// kernel: transformer_forward.26
= control target key start
LH: loop header
LB: loop body
LE: loop exit
PB: predicated region body
PF: predicated region fallthrough
CT: control target
= control target key end

     0   :  { %vm19_vm0 = vcmask 785408   ;;  %v151_v0 = vmov 0.0   ;;  %vm152_vm1 = vmmov 0   ;;  %vm47_vm2 = vcmask 261120   ;;  %s195_s1 = inlined_call_operand.vmem [shape: bf16[32,96], index: 1, kind: input, shape index: {}]   ;;  %s196_s0 = inlined_call_operand.vmem [shape: bf16[16,32], index: 0, kind: input, shape index: {}]   ;;  %s197_s2 = inlined_call_operand.vmem [shape: f32[1,96], index: 2, kind: input, shape index: {}]   ;;  %s198_s3 = inlined_call_operand.vmem [shape: bf16[16,96], index: 3, kind: output, shape index: {}]  }
   0x1   :  { %138 = vmatprep.subr.bf16.mxu0 %v151_v0  ;;  %v148_v1 = vld [vmem:[%s195_s1] sm:$0xff]   ;;  %142 = vmatprep.mubr.msk.bf16.mxu0 %vm152_vm1, %v151_v0  ;;  %20 = vst.msk [vmem:[#allocation2] sm:$0xff] %vm19_vm0, %v151_v0  ;;  %21 = vst.msk [vmem:[#allocation2 + $0x8] sm:$0xff] %vm19_vm0, %v151_v0  ;;  %v149_v2 = vld [vmem:[%s195_s1 + $0x8] sm:$0xff]   ;;  %vm119_vm3 = vcmask 781312  }
   0x2   :  { %139 = vmatpush3.bf16.msra.mxu0 %v148_v1  ;;  %v150_v3 = vld [vmem:[%s196_s0] sm:$0xff]  }
   0x3   :  { %140 = vmatprep.subr.bf16.mxu0 %v151_v0  ;;  %v130_v12 = vld [vmem:[%s197_s2] ss:$0 sm:$0xff] }
   0x6   :  { %141 = vmatpush3.bf16.msra.mxu0 %v149_v2 }
   0x8   :  { %v22_v4 = vld [vmem:[#allocation2] sm:$0xff]  ;;  %v23_v6 = vld [vmem:[#allocation2 + $0x8] sm:$0xff] }
   0x9   :  { %143 = vmatmul.mubr.msk.bf16.vlgmr.msra.gmra.mrb[0].mxu0 %vm47_vm2, %v150_v3 }
  0xdc   :  { %v85_v5 = vpop.f32.mrb[0].mxu0 }
  0xdd   :  { %v92_v7 = vadd.f32 %v85_v5, %v22_v4  ;;  %v144_v8 = vpop.f32.mrb[1].mxu0 }
  0xde   :  { %v88_v9 = vpop.f32.mrb[2].mxu0 }
  0xdf   :  { %95 = vst.msk [vmem:[#allocation2] sm:$0xff] %vm19_vm0, %v92_v7  ;;  %v93_v10 = vadd.f32 %v88_v9, %v23_v6  ;;  %v145_v11 = vpop.f32.mrb[3].mxu0 }
  0xe1   :  { %96 = vst.msk [vmem:[#allocation2 + $0x8] sm:$0xff] %vm19_vm0, %v93_v10 }
  0xe6   :  { %v100_v13 = vld [vmem:[#allocation2] sm:$0xff] }
  0xe7   :  { %v109_v14 = vadd.f32 %v130_v12, %v100_v13 }
  0xe8   :  { %v101_v15 = vld [vmem:[#allocation2 + $0x8] sm:$0xff] }
  0xe9   :  { %v133_v16 = vpack.c.bf16 %v109_v14, %v109_v14  ;;  %v110_v17 = vadd.f32 %v130_v12, %v101_v15 }
  0xeb   :  { %120 = vst.msk [vmem:[%s198_s3] sm:$0xf] %vm119_vm3, %v133_v16  ;;  %v134_v18 = vpack.c.bf16 %v110_v17, %v110_v17 }
  0xed   :  { %121 = vst.msk [vmem:[%s198_s3 + $0x4] sm:$0xf] %vm119_vm3, %v134_v18 }

// kernel: transformer_forward.25
= control target key start
LH: loop header
LB: loop body
LE: loop exit
PB: predicated region body
PF: predicated region fallthrough
CT: control target
= control target key end

     0   :  { %s219_s9 = smov 0   ;;  %s247_s0 = inlined_call_operand.vmem [shape: f32[16,32], index: 0, kind: input, shape index: {}]   ;;  %s248_s1 = inlined_call_operand.vmem [shape: f32[8,32], index: 1, kind: input, shape index: {}]   ;;  %s249_s2 = inlined_call_operand.vmem [shape: bf16[16,32], index: 2, kind: output, shape index: {}]  }
   0x1 LB: > { %s198_s10 = sadd.s32 4294967295, %s221_s9   ;;  %p202_p0 = scmp.ge.s32.totalorder %s221_s9, 1  ;;  %s221_s9 = sphi %s219_s9, %s12_s9  }
   0x2   : > { %p111_p1 = scmp.lt.s32.totalorder %s221_s9, 3 }
   0x4   : > { %p112_p2 = pnand %p202_p0, %p111_p1 }
   0x5   : > { %p131_p3 = scmp.lt.s32.totalorder (!%p112_p2), %s198_s10, 1  ;;  %v140_v0 = vld [vmem:[%s248_s1] sm:$0xff] (!%p112_p2)  ;;  %vm143_vm0 = vcmask (!%p112_p2), 257024  }
   0x6   : > { %115 = sbr.rel (%p112_p2) target bundleno = 22 (0x16), region = 28 }
   0xd   : > { %s251_s10 = smov (!%p131_p3, %s198_s10), 1 }
   0xe   : > { %s203_s11 = sshll.u32 %s251_s10, 3  ;;  %s204_s17 = sshll.u32 %s251_s10, 2 }
   0xf   : > { %s134_s16 = scalar_lea.vmem %s247_s0, %s203_s11  ;;  %s138_s20 = scalar_lea.vmem %s249_s2, %s204_s17 }
  0x10   : > { %v139_v1 = vld [vmem:[%s134_s16] sm:$0xff] }
  0x11   : > { %v141_v2 = vadd.f32 %v140_v0, %v139_v1 }
  0x13   : > { %v142_v3 = vpack.c.bf16 %v141_v2, %v141_v2 }
  0x15   : > { %144 = vst.msk [vmem:[%s138_s20] sm:$0xf] %vm143_vm0, %v142_v3 }
  0x16 PF: > { %s12_s9 = sadd.s32 1, %s221_s9  }
  0x17   : > { %p9_p4 = scmp.ge.s32.totalorder %s12_s9, 4  }
  0x19   :  { %11 = sbr.rel (!%p9_p4) target bundleno = 1 (0x1), region = 58 }

// kernel: transformer_forward.28
= control target key start
LH: loop header
LB: loop body
LE: loop exit
PB: predicated region body
PF: predicated region fallthrough
CT: control target
= control target key end

     0   :  { %vm28_vm0 = vcmask 261120   ;;  %v220_v0 = vmov 0.0   ;;  %vm221_vm1 = vmmov 0   ;;  %vm178_vm2 = vcmask 257024   ;;  %s293_s1 = inlined_call_operand.vmem [shape: bf16[32,32], index: 1, kind: input, shape index: {}]   ;;  %s294_s0 = inlined_call_operand.vmem [shape: bf16[16,32], index: 0, kind: input, shape index: {}]   ;;  %s295_s3 = inlined_call_operand.vmem [shape: bf16[16,32], index: 3, kind: input, shape index: {}]   ;;  %s296_s2 = inlined_call_operand.vmem [shape: f32[1,32], index: 2, kind: input, shape index: {}]   ;;  %s297_s4 = inlined_call_operand.vmem [shape: f32[1,32], index: 4, kind: input, shape index: {}]   ;;  %s298_s5 = inlined_call_operand.vmem [shape: f32[1,32], index: 5, kind: input, shape index: {}]   ;;  %s299_s6 = inlined_call_operand.vmem [shape: bf16[16,32], index: 6, kind: output, shape index: {}]  }
   0x1   :  { %203 = vmatprep.subr.bf16.mxu0 %v220_v0  ;;  %v213_v1 = vld [vmem:[%s293_s1] sm:$0xff]   ;;  %207 = vmatprep.mubr.msk.bf16.mxu0 %vm221_vm1, %v220_v0  ;;  %29 = vst.msk [vmem:[#allocation2] sm:$0xff] %vm28_vm0, %v220_v0  ;;  %30 = vst.msk [vmem:[#allocation2 + $0x8] sm:$0xff] %vm28_vm0, %v220_v0  ;;  %v214_v2 = vld [vmem:[%s293_s1 + $0x8] sm:$0xff]  }
   0x2   :  { %204 = vmatpush3.bf16.msra.mxu0 %v213_v1  ;;  %v215_v3 = vld [vmem:[%s294_s0] sm:$0xff]  }
   0x3   :  { %205 = vmatprep.subr.bf16.mxu0 %v220_v0  ;;  %v197_v12 = vld [vmem:[%s295_s3] sm:$0xff]  }
   0x4   :  { %v189_v13 = vld [vmem:[%s296_s2] ss:$0 sm:$0xff]  ;;  %v198_v14 = vunpack.c.l.bf16 %v197_v12  ;;  %v199_v17 = vunpack.c.h.bf16 %v197_v12 }
   0x5   :  { %v190_v41 = vld [vmem:[%s297_s4] ss:$0 sm:$0xff] }
   0x6   :  { %206 = vmatpush3.bf16.msra.mxu0 %v214_v2  ;;  %v191_v43 = vld [vmem:[%s298_s5] ss:$0 sm:$0xff] }
   0x8   :  { %v31_v4 = vld [vmem:[#allocation2] sm:$0xff]  ;;  %v32_v6 = vld [vmem:[#allocation2 + $0x8] sm:$0xff] }
   0x9   :  { %208 = vmatmul.mubr.msk.bf16.vlgmr.msra.gmra.mrb[0].mxu0 %vm28_vm0, %v215_v3 }
  0xdc   :  { %v94_v5 = vpop.f32.mrb[0].mxu0 }
  0xdd   :  { %v101_v7 = vadd.f32 %v94_v5, %v31_v4  ;;  %v209_v8 = vpop.f32.mrb[1].mxu0 }
  0xde   :  { %v97_v9 = vpop.f32.mrb[2].mxu0 }
  0xdf   :  { %103 = vst.msk [vmem:[#allocation2] sm:$0xff] %vm28_vm0, %v101_v7  ;;  %v102_v10 = vadd.f32 %v97_v9, %v32_v6  ;;  %v210_v11 = vpop.f32.mrb[3].mxu0 }
  0xe1   :  { %104 = vst.msk [vmem:[#allocation2 + $0x8] sm:$0xff] %vm28_vm0, %v102_v10 }
  0xe6   :  { %v108_v15 = vld [vmem:[#allocation2] sm:$0xff] }
  0xe7   :  { %v117_v16 = vadd.f32 %v189_v13, %v108_v15 }
  0xe8   :  { %v109_v18 = vld [vmem:[#allocation2 + $0x8] sm:$0xff] }
  0xe9   :  { %v123_v19 = vadd.f32 %v198_v14, %v117_v16  ;;  %v118_v20 = vadd.f32 %v189_v13, %v109_v18 }
  0xeb   :  { %v125_v21 = vsel %vm28_vm0, %v123_v19, 0.0  ;;  %v124_v22 = vadd.f32 %v199_v17, %v118_v20 }
  0xec   :  { %126 = vadd.xlane.f32.xlu0 %v125_v21 }
  0xed   :  { %v128_v23 = vsel %vm28_vm0, %v124_v22, 0.0 }
  0xf0   :  { %129 = vadd.xlane.f32.xlu0 %v128_v23 }
 0x179   :  { %v127_v24 = vpop.xlane.xlu0 %126 }
 0x17a   :  { %v132_v25 = vmul.f32 0.03125, %v127_v24 }
 0x17c   :  { %v134_v26 = vsub.f32 %v123_v19, %v132_v25 }
 0x17d   :  { %v130_v27 = vpop.xlane.xlu0 %129 }
 0x17e   :  { %v133_v28 = vmul.f32 0.03125, %v130_v27  ;;  %v136_v29 = vmul.f32 %v134_v26, %v134_v26 }
 0x180   :  { %v135_v30 = vsub.f32 %v124_v22, %v133_v28  ;;  %v138_v31 = vsel %vm28_vm0, %v136_v29, 0.0 }
 0x181   :  { %139 = vadd.xlane.f32.xlu1 %v138_v31 }
 0x182   :  { %v137_v32 = vmul.f32 %v135_v30, %v135_v30 }
 0x184   :  { %v141_v33 = vsel %vm28_vm0, %v137_v32, 0.0 }
 0x185   :  { %142 = vadd.xlane.f32.xlu1 %v141_v33 }
 0x20e   :  { %v140_v34 = vpop.xlane.xlu1 %139 }
 0x20f   :  { %v144_v35 = vmul.f32 0.03125, %v140_v34 }
 0x211   :  { %v146_v36 = vadd.f32 1e-05, %v144_v35 }
 0x212   :  { %v143_v37 = vpop.xlane.xlu1 %142 }
 0x213   :  { %216 = vrsqrt.f32 %v146_v36  ;;  %v145_v38 = vmul.f32 0.03125, %v143_v37 }
 0x215   :  { %v147_v39 = vadd.f32 1e-05, %v145_v38 }
 0x217   :  { %218 = vrsqrt.f32 %v147_v39 }
 0x21d   :  { %v217_v40 = vpop.eup %216 }
 0x21e   :  { %v150_v42 = vmul.f32 %v217_v40, %v134_v26 }
 0x220   :  { %v159_v44 = vmul.f32 %v190_v41, %v150_v42 }
 0x221   :  { %v219_v45 = vpop.eup %218 }
 0x222   :  { %v168_v46 = vadd.f32 %v191_v43, %v159_v44  ;;  %v151_v47 = vmul.f32 %v219_v45, %v135_v30 }
 0x224   :  { %v194_v48 = vpack.c.bf16 %v168_v46, %v168_v46  ;;  %v160_v49 = vmul.f32 %v190_v41, %v151_v47 }
 0x226   :  { %179 = vst.msk [vmem:[%s299_s6] sm:$0xf] %vm178_vm2, %v194_v48  ;;  %v169_v50 = vadd.f32 %v191_v43, %v160_v49 }
 0x228   :  { %v195_v51 = vpack.c.bf16 %v169_v50, %v169_v50 }
 0x22a   :  { %180 = vst.msk [vmem:[%s299_s6 + $0x4] sm:$0xf] %vm178_vm2, %v195_v51 }

// kernel: transformer_forward.27
= control target key start
LH: loop header
LB: loop body
LE: loop exit
PB: predicated region body
PF: predicated region fallthrough
CT: control target
= control target key end

     0   :  { %s943_s9 = smov 0   ;;  %s945_s10 = smov 0   ;;  %s1046_s0 = inlined_call_operand.vmem [shape: bf16[2,8,96], index: 0, kind: input, shape index: {}, may-alias: {0,1}]   ;;  %s1047_s1 = inlined_call_operand.vmem [shape: bf16[2,8,96], index: 1, kind: input, shape index: {}, may-alias: {0,1}]   ;;  %s1048_s2 = inlined_call_operand.vmem [shape: bf16[2,8,32], index: 2, kind: output, shape index: {}]  }
   0x1   :  { %s947_s11 = smov 0  }
   0x2 LB: > { %s24_s12 = sadd.s32 1, %s906_s10  ;;  %p750_p0 = scmp.ge.s32.totalorder %s910_s11, 1  ;;  %s910_s11 = sphi %s947_s11, %s12_s11   ;;  %s906_s10 = sphi %s945_s10, %s1050_s10   ;;  %s902_s9 = sphi %s943_s9, %s1049_s9  }
   0x3   : > { %p26_p1 = scmp.ge.s32.totalorder %s24_s12, 2  ;;  %p139_p2 = scmp.lt.s32.totalorder %s910_s11, 3 }
   0x5   : > { %s1052_s12 = smov (%p26_p1, %s24_s12), 0  ;;  %p140_p3 = pnand %p750_p0, %p139_p2 }
   0x6   : > { %p169_p4 = scmp.lt.s32.totalorder (!%p140_p3), %s902_s9, 1  ;;  %v912_v0 = vmov (!%p140_p3), 0.0   ;;  %vm913_vm0 = vmmov (!%p140_p3), 0   ;;  %s914_s17 = smov (!%p140_p3), 96   ;;  %vm195_vm1 = vcmask (!%p140_p3), 64512   ;;  %vm260_vm2 = vcmask (!%p140_p3), 1043456  }
   0x7   : > { %143 = sbr.rel (%p140_p3) target bundleno = 1601 (0x641), region = 28  ;;  %782 = vmatprep.subr.bf16.mxu0 (!%p140_p3), %v912_v0  ;;  %784 = vmatprep.mubr.msk.bf16.mxu0 (!%p140_p3), %vm913_vm0, %v912_v0  ;;  %s915_s21 = smov (!%p140_p3), 64   ;;  %vm653_vm3 = vcmask (!%p140_p3), 130048   ;;  %vm655_vm4 = vcmask (!%p140_p3), 195584   ;;  %vm658_vm5 = vcmask (!%p140_p3), 257024  }
   0x8   : > { %788 = vmatprep.subr.bf16.mxu1 (!%p140_p3), %v912_v0  ;;  %790 = vmatprep.mubr.msk.bf16.mxu1 (!%p140_p3), %vm913_vm0, %v912_v0  ;;  %s916_s22 = smov (!%p140_p3), 88   ;;  %s917_s23 = smov (!%p140_p3), 72  }
   0x9   : > { %s918_s24 = smov (!%p140_p3), 120   ;;  %s919_s25 = smov (!%p140_p3), 80  }
   0xa   : > { %s920_s26 = smov (!%p140_p3), 112   ;;  %s921_s27 = smov (!%p140_p3), 104  }
   0xb   : > { %s922_s28 = smov (!%p140_p3), 56   ;;  %s923_s29 = smov (!%p140_p3), 48  }
   0xc   : > { %s924_s30 = smov (!%p140_p3), 40   ;;  %s925_s3 = smov (!%p140_p3), 8  }
   0xd   : > { %s926_s4 = smov (!%p140_p3), 16   ;;  %s927_s5 = smov (!%p140_p3), 24  }
   0xe   : > { %s1054_s9 = smov (!%p169_p4, %s902_s9), 1 }
   0xf   : > { %s967_s13 = sshll.u32 %s1054_s9, 2 }
  0x10   : > { %s179_s16 = scalar_lea.vmem %s1047_s1, %s967_s13  ;;  %s175_s20 = scalar_lea.vmem %s1046_s0, %s967_s13 }
  0x11   : > { %v973_v1 = vld [vmem:[%s179_s16] ss:$0 sps:$4 sm:$0xff]   ;;  %s186_s8 = scalar_lea.vmem %s1048_s2, %s967_s13 }
  0x12   : > { %193 = vrot.lane.b32.xlu0 %v973_v1, %s914_s17  ;;  %v188_v4 = vld [vmem:[%s175_s20] sm:$0xf]  ;;  %255 = vrot.lane.b32.xlu1 %v973_v1, %s915_s21 }
  0x13   : > { %v757_v18 = vcombine.low %v188_v4, %v188_v4 }
  0x16   : > { %309 = vrot.lane.b32.xlu1 %v973_v1, %s916_s22 }
  0x84   : > { %v194_v2 = vpop.permute.xlu0 %193  ;;  %v256_v11 = vpop.permute.xlu1 %255 }
  0x85   : > { %v200_v3 = vsel %vm195_vm1, %v194_v2, 0  ;;  %v262_v12 = vsel %vm260_vm2, %v256_v11, 0 }
  0x86   : > { %783 = vmatpush3.bf16.xpose.msra.mxu0 %v200_v3  ;;  %789 = vmatpush3.bf16.msra.mxu1 %v262_v12 }
  0x87   : > { %800 = vmatprep.subr.bf16.mxu0 %v912_v0  ;;  %794 = vmatprep.subr.bf16.mxu1 %v912_v0 }
  0x88   : > { %v310_v19 = vpop.permute.xlu1 %309 }
  0x89   : > { %v315_v25 = vsel %vm195_vm1, %v310_v19, 0 }
  0x8d   : > { %785 = vmatmul.mubr.msk.bf16.vlgmr.msra.gmra.mrb[0].mxu0 %vm195_vm1, %v188_v4 }
  0x8e   : > { %802 = vmatprep.mubr.msk.bf16.mxu0 %vm913_vm0, %v912_v0 }
 0x160   : > { %v236_v5 = vpop.f32.mrb[0].mxu0 }
 0x161   : > { %v242_v6 = vmul.f32 0.35355338, %v236_v5  ;;  %v786_v7 = vpop.f32.mrb[1].mxu0 }
 0x162   : > { %v239_v8 = vpop.f32.mrb[2].mxu0 }
 0x163   : > { %v787_v9 = vpop.f32.mrb[3].mxu0  ;;  %v243_v10 = vsel %vm195_vm1, %v242_v6, -inf }
 0x164   : > { %244 = vmax.xlane.f32.xlu0 %v243_v10 }
 0x17a   : > { %531 = vrot.lane.b32.xlu0 %v973_v1, %s917_s23 }
 0x1f1   : > { %v245_v13 = vpop.xlane.xlu0 %244 }
 0x1f2   : > { %v246_v14 = vsub.f32 %v242_v6, %v245_v13 }
 0x1f4   : > { %v247_v15 = vmul.f32 1.442695, %v246_v14 }
 0x1f5   : > { %v532_v28 = vpop.permute.xlu0 %531 }
 0x1f6   : > { %872 = vpow2.f32 %v247_v15  ;;  %v537_v30 = vsel %vm195_vm1, %v532_v28, 0 }
 0x200   : > { %v873_v16 = vpop.eup %872 }
 0x201   : > { %v249_v17 = vsel %vm195_vm1, %v873_v16, 0.0 }
 0x202   : > { %250 = vadd.xlane.f32.xlu1 %v249_v17 }
 0x213   : > { %307 = vrot.lane.b32.xlu1 %v757_v18, %s918_s24 }
 0x217   : > { %420 = vrot.lane.b32.xlu1 %v973_v1, %s919_s25 }
 0x21b   : > { %418 = vrot.lane.b32.xlu1 %v757_v18, %s920_s26 }
 0x21f   : > { %529 = vrot.lane.b32.xlu1 %v757_v18, %s921_s27 }
 0x28f   : > { %v251_v20 = vpop.xlane.xlu1 %250 }
 0x290   : > { %874 = vrcp.f32 %v251_v20 }
 0x293   : > { %v308_v23 = vpop.permute.xlu1 %307 }
 0x297   : > { %v421_v26 = vpop.permute.xlu1 %420 }
 0x298   : > { %v426_v27 = vsel %vm195_vm1, %v421_v26, 0 }
 0x29a   : > { %v875_v21 = vpop.eup %874 }
 0x29b   : > { %v253_v22 = vmul.f32 %v875_v21, %v873_v16  ;;  %v419_v29 = vpop.permute.xlu1 %418 }
 0x29d   : > { %v254_v24 = vpack.c.bf16 %v253_v22, %v253_v22 }
 0x29f   : > { %791 = vmatmul.mubr.msk.bf16.vlgmr.msra.gmra.mrb[0].mxu1 %vm195_vm1, %v254_v24  ;;  %v530_v31 = vpop.permute.xlu1 %529 }
 0x2a0   : > { %795 = vmatpush3.bf16.xpose.msra.mxu1 %v315_v25  ;;  %796 = vmatprep.mubr.msk.bf16.mxu1 %vm913_vm0, %v912_v0 }
 0x2a1   : > { %806 = vmatprep.subr.bf16.mxu1 %v912_v0 }
 0x2a7   : > { %797 = vmatmul.mubr.msk.bf16.vlgmr.msra.gmra.mrb[4].mxu1 %vm195_vm1, %v308_v23 }
 0x2a8   : > { %807 = vmatpush3.bf16.xpose.msra.mxu1 %v426_v27  ;;  %808 = vmatprep.mubr.msk.bf16.mxu1 %vm913_vm0, %v912_v0 }
 0x2a9   : > { %818 = vmatprep.subr.bf16.mxu1 %v912_v0 }
 0x2af   : > { %809 = vmatmul.mubr.msk.bf16.vlgmr.msra.gmra.mrb[8].mxu1 %vm195_vm1, %v419_v29 }
 0x2b0   : > { %819 = vmatpush3.bf16.xpose.msra.mxu1 %v537_v30  ;;  %820 = vmatprep.mubr.msk.bf16.mxu1 %vm913_vm0, %v912_v0 }
 0x2b7   : > { %821 = vmatmul.mubr.msk.bf16.vlgmr.msra.gmra.mrb[12].mxu1 %vm195_vm1, %v530_v31 }
 0x372   : > { %v1008_v32 = vpop.f32.mrb[0].mxu1 }
 0x373   : > { %v792_v33 = vpop.f32.mrb[1].mxu1 }
 0x374   : > { %v301_v34 = vpop.f32.mrb[2].mxu1 }
 0x375   : > { %v793_v35 = vpop.f32.mrb[3].mxu1 }
 0x37a   : > { %v351_v36 = vpop.f32.mrb[4].mxu1 }
 0x37b   : > { %v357_v37 = vmul.f32 0.35355338, %v351_v36  ;;  %v798_v38 = vpop.f32.mrb[5].mxu1 }
 0x37c   : > { %v354_v39 = vpop.f32.mrb[6].mxu1 }
 0x37d   : > { %v799_v40 = vpop.f32.mrb[7].mxu1  ;;  %v358_v41 = vsel %vm195_vm1, %v357_v37, -inf }
 0x37e   : > { %359 = vmax.xlane.f32.xlu1 %v358_v41 }
 0x382   : > { %v462_v42 = vpop.f32.mrb[8].mxu1 }
 0x383   : > { %v468_v43 = vmul.f32 0.35355338, %v462_v42  ;;  %v810_v44 = vpop.f32.mrb[9].mxu1 }
 0x384   : > { %v465_v45 = vpop.f32.mrb[10].mxu1 }
 0x385   : > { %v469_v46 = vsel %vm195_vm1, %v468_v43, -inf  ;;  %v811_v47 = vpop.f32.mrb[11].mxu1 }
 0x386   : > { %470 = vmax.xlane.f32.xlu0 %v469_v46 }
 0x38a   : > { %v573_v48 = vpop.f32.mrb[12].mxu1 }
 0x38b   : > { %v579_v49 = vmul.f32 0.35355338, %v573_v48  ;;  %v822_v50 = vpop.f32.mrb[13].mxu1 }
 0x38c   : > { %v576_v51 = vpop.f32.mrb[14].mxu1 }
 0x38d   : > { %v580_v52 = vsel %vm195_vm1, %v579_v49, -inf  ;;  %v823_v53 = vpop.f32.mrb[15].mxu1 }
 0x38e   : > { %581 = vmax.xlane.f32.xlu1 %v580_v52 }
 0x40b   : > { %v360_v54 = vpop.xlane.xlu1 %359 }
 0x40c   : > { %v361_v55 = vsub.f32 %v357_v37, %v360_v54 }
 0x40e   : > { %v362_v56 = vmul.f32 1.442695, %v361_v55 }
 0x410   : > { %876 = vpow2.f32 %v362_v56 }
 0x413   : > { %v471_v2 = vpop.xlane.xlu0 %470 }
 0x414   : > { %v472_v3 = vsub.f32 %v468_v43, %v471_v2 }
 0x416   : > { %v473_v4 = vmul.f32 1.442695, %v472_v3 }
 0x41a   : > { %v877_v57 = vpop.eup %876 }
 0x41b   : > { %v582_v58 = vpop.xlane.xlu1 %581  ;;  %v364_v59 = vsel %vm195_vm1, %v877_v57, 0.0 }
 0x41c   : > { %v583_v60 = vsub.f32 %v579_v49, %v582_v58  ;;  %365 = vadd.xlane.f32.xlu1 %v364_v59 }
 0x41e   : > { %v584_v61 = vmul.f32 1.442695, %v583_v60 }
 0x420   : > { %878 = vpow2.f32 %v584_v61 }
 0x421   : > { %880 = vpow2.f32 %v473_v4 }
 0x42a   : > { %v879_v62 = vpop.eup %878 }
 0x42b   : > { %v586_v63 = vsel %vm195_vm1, %v879_v62, 0.0  ;;  %v881_v5 = vpop.eup %880 }
 0x42c   : > { %587 = vadd.xlane.f32.xlu0 %v586_v63  ;;  %v475_v6 = vsel %vm195_vm1, %v881_v5, 0.0 }
 0x42d   : > { %370 = vrot.lane.b32.xlu1 %v973_v1, %s922_s28 }
 0x442   : > { %481 = vrot.lane.b32.xlu0 %v973_v1, %s923_s29 }
 0x451   : > { %476 = vadd.xlane.f32.xlu1 %v475_v6 }
 0x462   : > { %592 = vrot.lane.b32.xlu1 %v973_v1, %s924_s30 }
 0x4a9   : > { %v366_v7 = vpop.xlane.xlu1 %365 }
 0x4aa   : > { %882 = vrcp.f32 %v366_v7 }
 0x4ad   : > { %v371_v8 = vpop.permute.xlu1 %370 }
 0x4ae   : > { %v376_v9 = vsel %vm260_vm2, %v371_v8, 0 }
 0x4af   : > { %801 = vmatpush3.bf16.msra.mxu0 %v376_v9 }
 0x4b0   : > { %812 = vmatprep.subr.bf16.mxu0 %v912_v0 }
 0x4b4   : > { %v883_v10 = vpop.eup %882 }
 0x4b5   : > { %v368_v11 = vmul.f32 %v883_v10, %v877_v57 }
 0x4b7   : > { %v369_v12 = vpack.c.bf16 %v368_v11, %v368_v11 }
 0x4b9   : > { %803 = vmatmul.mubr.msk.bf16.vlgmr.msra.gmra.mrb[4].mxu0 %vm195_vm1, %v369_v12  ;;  %v588_v13 = vpop.xlane.xlu0 %587 }
 0x4ba   : > { %814 = vmatprep.mubr.msk.bf16.mxu0 %vm913_vm0, %v912_v0 }
 0x4bd   : > { %v482_v14 = vpop.permute.xlu0 %481 }
 0x4be   : > { %v487_v1 = vsel %vm260_vm2, %v482_v14, 0 }
 0x4bf   : > { %813 = vmatpush3.bf16.msra.mxu0 %v487_v1 }
 0x4c0   : > { %824 = vmatprep.subr.bf16.mxu0 %v912_v0 }
 0x4de   : > { %v477_v15 = vpop.xlane.xlu1 %476 }
 0x4df   : > { %884 = vrcp.f32 %v477_v15 }
 0x4e0   : > { %886 = vrcp.f32 %v588_v13 }
 0x4e2   : > { %v593_v17 = vpop.permute.xlu1 %592 }
 0x4e3   : > { %v598_v19 = vsel %vm260_vm2, %v593_v17, 0 }
 0x4e9   : > { %v885_v16 = vpop.eup %884 }
 0x4ea   : > { %v479_v18 = vmul.f32 %v885_v16, %v881_v5  ;;  %v887_v21 = vpop.eup %886 }
 0x4eb   : > { %v590_v22 = vmul.f32 %v887_v21, %v879_v62 }
 0x4ec   : > { %v480_v20 = vpack.c.bf16 %v479_v18, %v479_v18 }
 0x4ed   : > { %v591_v23 = vpack.c.bf16 %v590_v22, %v590_v22 }
 0x4ee   : > { %815 = vmatmul.mubr.msk.bf16.vlgmr.msra.gmra.mrb[8].mxu0 %vm195_vm1, %v480_v20 }
 0x4ef   : > { %825 = vmatpush3.bf16.msra.mxu0 %v598_v19  ;;  %826 = vmatprep.mubr.msk.bf16.mxu0 %vm913_vm0, %v912_v0 }
 0x4f6   : > { %827 = vmatmul.mubr.msk.bf16.vlgmr.msra.gmra.mrb[12].mxu0 %vm195_vm1, %v591_v23 }
 0x58c   : > { %v412_v24 = vpop.f32.mrb[4].mxu0 }
 0x58d   : > { %641 = vrot.lane.b32.xlu1 %v412_v24, %s925_s3  ;;  %v804_v25 = vpop.f32.mrb[5].mxu0 }
 0x58e   : > { %v415_v26 = vpop.f32.mrb[6].mxu0 }
 0x58f   : > { %v805_v27 = vpop.f32.mrb[7].mxu0 }
 0x5c1   : > { %v523_v28 = vpop.f32.mrb[8].mxu0 }
 0x5c2   : > { %645 = vrot.lane.b32.xlu0 %v523_v28, %s926_s4  ;;  %v816_v29 = vpop.f32.mrb[9].mxu0 }
 0x5c3   : > { %v526_v30 = vpop.f32.mrb[10].mxu0 }
 0x5c4   : > { %v817_v31 = vpop.f32.mrb[11].mxu0 }
 0x5c9   : > { %v634_v33 = vpop.f32.mrb[12].mxu0 }
 0x5ca   : > { %649 = vrot.lane.b32.xlu1 %v634_v33, %s927_s5  ;;  %v828_v0 = vpop.f32.mrb[13].mxu0 }
 0x5cb   : > { %v637_v34 = vpop.f32.mrb[14].mxu0 }
 0x5cc   : > { %v829_v35 = vpop.f32.mrb[15].mxu0 }
 0x5ff   : > { %v642_v36 = vpop.permute.xlu1 %641 }
 0x600   : > { %v652_v38 = vsel %vm195_vm1, %v1008_v32, %v642_v36 }
 0x634   : > { %v646_v37 = vpop.permute.xlu0 %645 }
 0x635   : > { %v654_v39 = vsel %vm653_vm3, %v652_v38, %v646_v37 }
 0x63c   : > { %v650_v40 = vpop.permute.xlu1 %649 }
 0x63d   : > { %v656_v41 = vsel %vm655_vm4, %v654_v39, %v650_v40 }
 0x63e   : > { %v657_v42 = vpack.c.bf16 %v656_v41, %v656_v41 }
 0x640   : > { %659 = vst.msk [vmem:[%s186_s8] sm:$0xf] %vm658_vm5, %v657_v42 }
 0x641 PF: > { %s12_s11 = sadd.s32 1, %s910_s11   ;;  %s1049_s9 = smov %s906_s10 }
 0x642   : > { %p9_p5 = scmp.ge.s32.totalorder %s12_s11, 4   ;;  %s1050_s10 = smov %s1052_s12 }
 0x644   :  { %11 = sbr.rel (!%p9_p5) target bundleno = 2 (0x2), region = 61 }

// kernel: transformer_forward.38
= control target key start
LH: loop header
LB: loop body
LE: loop exit
PB: predicated region body
PF: predicated region fallthrough
CT: control target
= control target key end

     0   :  { %vm19_vm0 = vcmask 523264   ;;  %v151_v0 = vmov 0.0   ;;  %vm152_vm1 = vmmov 0   ;;  %vm47_vm2 = vcmask 261120   ;;  %s195_s1 = inlined_call_operand.vmem [shape: bf16[32,64], index: 1, kind: input, shape index: {}]   ;;  %s196_s0 = inlined_call_operand.vmem [shape: bf16[16,32], index: 0, kind: input, shape index: {}]   ;;  %s197_s2 = inlined_call_operand.vmem [shape: f32[1,64], index: 2, kind: input, shape index: {}]   ;;  %s198_s3 = inlined_call_operand.vmem [shape: bf16[16,64], index: 3, kind: output, shape index: {}]  }
   0x1   :  { %138 = vmatprep.subr.bf16.mxu0 %v151_v0  ;;  %v148_v1 = vld [vmem:[%s195_s1] sm:$0xff]   ;;  %142 = vmatprep.mubr.msk.bf16.mxu0 %vm152_vm1, %v151_v0  ;;  %20 = vst.msk [vmem:[#allocation2] sm:$0xff] %vm19_vm0, %v151_v0  ;;  %21 = vst.msk [vmem:[#allocation2 + $0x8] sm:$0xff] %vm19_vm0, %v151_v0  ;;  %v149_v2 = vld [vmem:[%s195_s1 + $0x8] sm:$0xff]   ;;  %vm119_vm3 = vcmask 519168  }
   0x2   :  { %139 = vmatpush3.bf16.msra.mxu0 %v148_v1  ;;  %v150_v3 = vld [vmem:[%s196_s0] sm:$0xff]  }
   0x3   :  { %140 = vmatprep.subr.bf16.mxu0 %v151_v0  ;;  %v130_v12 = vld [vmem:[%s197_s2] ss:$0 sm:$0xff] }
   0x6   :  { %141 = vmatpush3.bf16.msra.mxu0 %v149_v2 }
   0x8   :  { %v22_v4 = vld [vmem:[#allocation2] sm:$0xff]  ;;  %v23_v6 = vld [vmem:[#allocation2 + $0x8] sm:$0xff] }
   0x9   :  { %143 = vmatmul.mubr.msk.bf16.vlgmr.msra.gmra.mrb[0].mxu0 %vm47_vm2, %v150_v3 }
  0xdc   :  { %v85_v5 = vpop.f32.mrb[0].mxu0 }
  0xdd   :  { %v92_v7 = vadd.f32 %v85_v5, %v22_v4  ;;  %v144_v8 = vpop.f32.mrb[1].mxu0 }
  0xde   :  { %v88_v9 = vpop.f32.mrb[2].mxu0 }
  0xdf   :  { %95 = vst.msk [vmem:[#allocation2] sm:$0xff] %vm19_vm0, %v92_v7  ;;  %v93_v10 = vadd.f32 %v88_v9, %v23_v6  ;;  %v145_v11 = vpop.f32.mrb[3].mxu0 }
  0xe1   :  { %96 = vst.msk [vmem:[#allocation2 + $0x8] sm:$0xff] %vm19_vm0, %v93_v10 }
  0xe6   :  { %v100_v13 = vld [vmem:[#allocation2] sm:$0xff] }
  0xe7   :  { %v109_v14 = vadd.f32 %v130_v12, %v100_v13 }
  0xe8   :  { %v101_v15 = vld [vmem:[#allocation2 + $0x8] sm:$0xff] }
  0xe9   :  { %v133_v16 = vpack.c.bf16 %v109_v14, %v109_v14  ;;  %v110_v17 = vadd.f32 %v130_v12, %v101_v15 }
  0xeb   :  { %120 = vst.msk [vmem:[%s198_s3] sm:$0xf] %vm119_vm3, %v133_v16  ;;  %v134_v18 = vpack.c.bf16 %v110_v17, %v110_v17 }
  0xed   :  { %121 = vst.msk [vmem:[%s198_s3 + $0x4] sm:$0xf] %vm119_vm3, %v134_v18 }

// kernel: transformer_forward.37
= control target key start
LH: loop header
LB: loop body
LE: loop exit
PB: predicated region body
PF: predicated region fallthrough
CT: control target
= control target key end

     0   :  { %vm19_vm0 = vcmask 261120   ;;  %v150_v0 = vmov 0.0   ;;  %vm151_vm1 = vmmov 0   ;;  %vm118_vm2 = vcmask 257024   ;;  %s195_s1 = inlined_call_operand.vmem [shape: bf16[32,32], index: 1, kind: input, shape index: {}]   ;;  %s196_s0 = inlined_call_operand.vmem [shape: bf16[16,32], index: 0, kind: input, shape index: {}]   ;;  %s197_s2 = inlined_call_operand.vmem [shape: f32[1,32], index: 2, kind: input, shape index: {}]   ;;  %s198_s3 = inlined_call_operand.vmem [shape: bf16[16,32], index: 3, kind: output, shape index: {}]  }
   0x1   :  { %137 = vmatprep.subr.bf16.mxu0 %v150_v0  ;;  %v147_v1 = vld [vmem:[%s195_s1] sm:$0xff]   ;;  %141 = vmatprep.mubr.msk.bf16.mxu0 %vm151_vm1, %v150_v0  ;;  %20 = vst.msk [vmem:[#allocation2] sm:$0xff] %vm19_vm0, %v150_v0  ;;  %21 = vst.msk [vmem:[#allocation2 + $0x8] sm:$0xff] %vm19_vm0, %v150_v0  ;;  %v148_v2 = vld [vmem:[%s195_s1 + $0x8] sm:$0xff]  }
   0x2   :  { %138 = vmatpush3.bf16.msra.mxu0 %v147_v1  ;;  %v149_v3 = vld [vmem:[%s196_s0] sm:$0xff]  }
   0x3   :  { %139 = vmatprep.subr.bf16.mxu0 %v150_v0  ;;  %v129_v12 = vld [vmem:[%s197_s2] ss:$0 sm:$0xff] }
   0x6   :  { %140 = vmatpush3.bf16.msra.mxu0 %v148_v2 }
   0x8   :  { %v22_v4 = vld [vmem:[#allocation2] sm:$0xff]  ;;  %v23_v6 = vld [vmem:[#allocation2 + $0x8] sm:$0xff] }
   0x9   :  { %142 = vmatmul.mubr.msk.bf16.vlgmr.msra.gmra.mrb[0].mxu0 %vm19_vm0, %v149_v3 }
  0xdc   :  { %v85_v5 = vpop.f32.mrb[0].mxu0 }
  0xdd   :  { %v92_v7 = vadd.f32 %v85_v5, %v22_v4  ;;  %v143_v8 = vpop.f32.mrb[1].mxu0 }
  0xde   :  { %v88_v9 = vpop.f32.mrb[2].mxu0 }
  0xdf   :  { %94 = vst.msk [vmem:[#allocation2] sm:$0xff] %vm19_vm0, %v92_v7  ;;  %v93_v10 = vadd.f32 %v88_v9, %v23_v6  ;;  %v144_v11 = vpop.f32.mrb[3].mxu0 }
  0xe1   :  { %95 = vst.msk [vmem:[#allocation2 + $0x8] sm:$0xff] %vm19_vm0, %v93_v10 }
  0xe6   :  { %v99_v13 = vld [vmem:[#allocation2] sm:$0xff] }
  0xe7   :  { %v108_v14 = vadd.f32 %v129_v12, %v99_v13 }
  0xe8   :  { %v100_v15 = vld [vmem:[#allocation2 + $0x8] sm:$0xff] }
  0xe9   :  { %v132_v16 = vpack.c.bf16 %v108_v14, %v108_v14  ;;  %v109_v17 = vadd.f32 %v129_v12, %v100_v15 }
  0xeb   :  { %119 = vst.msk [vmem:[%s198_s3] sm:$0xf] %vm118_vm2, %v132_v16  ;;  %v133_v18 = vpack.c.bf16 %v109_v17, %v109_v17 }
  0xed   :  { %120 = vst.msk [vmem:[%s198_s3 + $0x4] sm:$0xf] %vm118_vm2, %v133_v18 }

// kernel: transformer_forward.29
= control target key start
LH: loop header
LB: loop body
LE: loop exit
PB: predicated region body
PF: predicated region fallthrough
CT: control target
= control target key end

     0   :  { %vm31_vm0 = vcmask 261120   ;;  %v337_v0 = vmov 0.0   ;;  %vm338_vm1 = vmmov 0   ;;  %vm146_vm2 = vcmask 523264   ;;  %s430_s1 = inlined_call_operand.vmem [shape: bf16[32,64], index: 1, kind: input, shape index: {}]   ;;  %s431_s3 = inlined_call_operand.vmem [shape: bf16[64,32], index: 3, kind: input, shape index: {}]   ;;  %s432_s0 = inlined_call_operand.vmem [shape: bf16[16,32], index: 0, kind: input, shape index: {}]   ;;  %s433_s2 = inlined_call_operand.vmem [shape: f32[1,64], index: 2, kind: input, shape index: {}]   ;;  %s434_s4 = inlined_call_operand.vmem [shape: f32[1,32], index: 4, kind: input, shape index: {}]   ;;  %s435_s5 = inlined_call_operand.vmem [shape: f32[1,32], index: 5, kind: input, shape index: {}]   ;;  %s436_s6 = inlined_call_operand.vmem [shape: f32[1,32], index: 6, kind: input, shape index: {}]   ;;  %s437_s7 = inlined_call_operand.vmem [shape: bf16[16,32], index: 7, kind: output, shape index: {}]  }
   0x1   :  { %304 = vmatprep.subr.bf16.mxu0 %v337_v0  ;;  %v326_v1 = vld [vmem:[%s430_s1] sm:$0xff]   ;;  %308 = vmatprep.mubr.msk.bf16.mxu0 %vm338_vm1, %v337_v0  ;;  %32 = vst.msk [vmem:[#allocation2] sm:$0xff] %vm31_vm0, %v337_v0  ;;  %33 = vst.msk [vmem:[#allocation2 + $0x8] sm:$0xff] %vm31_vm0, %v337_v0  ;;  %v327_v2 = vld [vmem:[%s430_s1 + $0x8] sm:$0xff]   ;;  %vm268_vm3 = vcmask 257024  }
   0x2   :  { %312 = vmatprep.subr.bf16.mxu1 %v337_v0  ;;  %320 = vmatprep.mubr.msk.bf16.mxu1 %vm338_vm1, %v337_v0  ;;  %v329_v3 = vld [vmem:[%s431_s3] sm:$0xff]   ;;  %v330_v5 = vld [vmem:[%s431_s3 + $0x8] sm:$0xff]   ;;  %v331_v6 = vld [vmem:[%s431_s3 + $0x10] sm:$0xff]  }
   0x3   :  { %305 = vmatpush3.bf16.msra.mxu0 %v326_v1  ;;  %v328_v4 = vld [vmem:[%s432_s0] sm:$0xff]   ;;  %313 = vmatpush3.bf16.msra.mxu1 %v329_v3  ;;  %v332_v7 = vld [vmem:[%s431_s3 + $0x18] sm:$0xff]  }
   0x4   :  { %306 = vmatprep.subr.bf16.mxu0 %v337_v0  ;;  %314 = vmatprep.subr.bf16.mxu1 %v337_v0  ;;  %v275_v8 = vld [vmem:[%s433_s2] ss:$0 sm:$0xff] }
   0x5   :  { %v293_v26 = vld [vmem:[%s432_s0] sm:$0xff]  }
   0x6   :  { %v285_v27 = vld [vmem:[%s434_s4] ss:$0 sm:$0xff]  ;;  %v294_v28 = vunpack.c.l.bf16 %v293_v26  ;;  %v295_v31 = vunpack.c.h.bf16 %v293_v26 }
   0x7   :  { %307 = vmatpush3.bf16.msra.mxu0 %v327_v2  ;;  %315 = vmatpush3.bf16.msra.mxu1 %v330_v5  ;;  %v286_v55 = vld [vmem:[%s435_s5] ss:$0 sm:$0xff] }
   0x8   :  { %316 = vmatprep.subr.bf16.mxu1 %v337_v0  ;;  %v111_v18 = vld [vmem:[#allocation2] sm:$0xff]  ;;  %v112_v20 = vld [vmem:[#allocation2 + $0x8] sm:$0xff] }
   0x9   :  { %v287_v57 = vld [vmem:[%s436_s6] ss:$0 sm:$0xff] }
   0xa   :  { %309 = vmatmul.mubr.msk.bf16.vlgmr.msra.gmra.mrb[0].mxu0 %vm31_vm0, %v328_v4 }
   0xb   :  { %317 = vmatpush3.bf16.msra.mxu1 %v331_v6 }
   0xc   :  { %318 = vmatprep.subr.bf16.mxu1 %v337_v0 }
   0xf   :  { %319 = vmatpush3.bf16.msra.mxu1 %v332_v7 }
  0xdd   :  { %v102_v9 = vpop.f32.mrb[0].mxu0 }
  0xde   :  { %v103_v10 = vadd.f32 %v275_v8, %v102_v9  ;;  %v310_v11 = vpop.f32.mrb[1].mxu0 }
  0xdf   :  { %v105_v12 = vpop.f32.mrb[2].mxu0 }
  0xe0   :  { %v106_v13 = vadd.f32 %v275_v8, %v105_v12  ;;  %v311_v14 = vpop.f32.mrb[3].mxu0  ;;  %v109_v15 = vmax.f32 %v103_v10, 0.0 }
  0xe2   :  { %v110_v16 = vmax.f32 %v106_v13, 0.0 }
  0xe4   :  { %v113_v17 = vpack.c.bf16 %v110_v16, %v109_v15 }
  0xe6   :  { %321 = vmatmul.mubr.msk.bf16.vlgmr.msra.gmra.mrb[0].mxu1 %vm146_vm2, %v113_v17 }
 0x1b9   :  { %v184_v19 = vpop.f32.mrb[0].mxu1 }
 0x1ba   :  { %v191_v21 = vadd.f32 %v184_v19, %v111_v18  ;;  %v322_v22 = vpop.f32.mrb[1].mxu1 }
 0x1bb   :  { %v187_v23 = vpop.f32.mrb[2].mxu1 }
 0x1bc   :  { %193 = vst.msk [vmem:[#allocation2] sm:$0xff] %vm31_vm0, %v191_v21  ;;  %v192_v24 = vadd.f32 %v187_v23, %v112_v20  ;;  %v323_v25 = vpop.f32.mrb[3].mxu1 }
 0x1be   :  { %194 = vst.msk [vmem:[#allocation2 + $0x8] sm:$0xff] %vm31_vm0, %v192_v24 }
 0x1c3   :  { %v198_v29 = vld [vmem:[#allocation2] sm:$0xff] }
 0x1c4   :  { %v207_v30 = vadd.f32 %v285_v27, %v198_v29 }
 0x1c5   :  { %v199_v32 = vld [vmem:[#allocation2 + $0x8] sm:$0xff] }
 0x1c6   :  { %v213_v33 = vadd.f32 %v294_v28, %v207_v30  ;;  %v208_v34 = vadd.f32 %v285_v27, %v199_v32 }
 0x1c8   :  { %v215_v35 = vsel %vm31_vm0, %v213_v33, 0.0  ;;  %v214_v36 = vadd.f32 %v295_v31, %v208_v34 }
 0x1c9   :  { %216 = vadd.xlane.f32.xlu0 %v215_v35 }
 0x1ca   :  { %v218_v37 = vsel %vm31_vm0, %v214_v36, 0.0 }
 0x1cd   :  { %219 = vadd.xlane.f32.xlu0 %v218_v37 }
 0x256   :  { %v217_v38 = vpop.xlane.xlu0 %216 }
 0x257   :  { %v222_v39 = vmul.f32 0.03125, %v217_v38 }
 0x259   :  { %v224_v40 = vsub.f32 %v213_v33, %v222_v39 }
 0x25a   :  { %v220_v41 = vpop.xlane.xlu0 %219 }
 0x25b   :  { %v223_v42 = vmul.f32 0.03125, %v220_v41  ;;  %v226_v43 = vmul.f32 %v224_v40, %v224_v40 }
 0x25d   :  { %v225_v44 = vsub.f32 %v214_v36, %v223_v42  ;;  %v228_v45 = vsel %vm31_vm0, %v226_v43, 0.0 }
 0x25e   :  { %229 = vadd.xlane.f32.xlu1 %v228_v45 }
 0x25f   :  { %v227_v46 = vmul.f32 %v225_v44, %v225_v44 }
 0x261   :  { %v231_v47 = vsel %vm31_vm0, %v227_v46, 0.0 }
 0x262   :  { %232 = vadd.xlane.f32.xlu1 %v231_v47 }
 0x2eb   :  { %v230_v48 = vpop.xlane.xlu1 %229 }
 0x2ec   :  { %v234_v49 = vmul.f32 0.03125, %v230_v48 }
 0x2ee   :  { %v236_v50 = vadd.f32 1e-05, %v234_v49 }
 0x2ef   :  { %v233_v51 = vpop.xlane.xlu1 %232 }
 0x2f0   :  { %333 = vrsqrt.f32 %v236_v50  ;;  %v235_v52 = vmul.f32 0.03125, %v233_v51 }
 0x2f2   :  { %v237_v53 = vadd.f32 1e-05, %v235_v52 }
 0x2f4   :  { %335 = vrsqrt.f32 %v237_v53 }
 0x2fa   :  { %v334_v54 = vpop.eup %333 }
 0x2fb   :  { %v240_v56 = vmul.f32 %v334_v54, %v224_v40 }
 0x2fd   :  { %v249_v58 = vmul.f32 %v286_v55, %v240_v56 }
 0x2fe   :  { %v336_v59 = vpop.eup %335 }
 0x2ff   :  { %v258_v60 = vadd.f32 %v287_v57, %v249_v58  ;;  %v241_v61 = vmul.f32 %v336_v59, %v225_v44 }
 0x301   :  { %v290_v62 = vpack.c.bf16 %v258_v60, %v258_v60  ;;  %v250_v63 = vmul.f32 %v286_v55, %v241_v61 }
 0x303   :  { %269 = vst.msk [vmem:[%s437_s7] sm:$0xf] %vm268_vm3, %v290_v62  ;;  %v259_v0 = vadd.f32 %v287_v57, %v250_v63 }
 0x305   :  { %v291_v1 = vpack.c.bf16 %v259_v0, %v259_v0 }
 0x307   :  { %270 = vst.msk [vmem:[%s437_s7 + $0x4] sm:$0xf] %vm268_vm3, %v291_v1 }

// kernel: transformer_forward.35
= control target key start
LH: loop header
LB: loop body
LE: loop exit
PB: predicated region body
PF: predicated region fallthrough
CT: control target
= control target key end

     0   :  { %s958_s9 = smov 0   ;;  %s960_s10 = smov 0   ;;  %s1067_s0 = inlined_call_operand.vmem [shape: bf16[2,8,96], index: 0, kind: input, shape index: {}, may-alias: {0,1}]   ;;  %s1068_s1 = inlined_call_operand.vmem [shape: bf16[2,8,96], index: 1, kind: input, shape index: {}, may-alias: {0,1}]   ;;  %s1069_s2 = inlined_call_operand.vmem [shape: bf16[2,8,32], index: 2, kind: output, shape index: {}]  }
   0x1   :  { %s962_s11 = smov 0  }
   0x2 LB: > { %s24_s12 = sadd.s32 1, %s920_s10  ;;  %p763_p0 = scmp.ge.s32.totalorder %s924_s11, 1  ;;  %s924_s11 = sphi %s962_s11, %s12_s11   ;;  %s920_s10 = sphi %s960_s10, %s1071_s10   ;;  %s916_s9 = sphi %s958_s9, %s1070_s9  }
   0x3   : > { %p26_p1 = scmp.ge.s32.totalorder %s24_s12, 2  ;;  %p139_p2 = scmp.lt.s32.totalorder %s924_s11, 3 }
   0x5   : > { %s1073_s12 = smov (%p26_p1, %s24_s12), 0  ;;  %p140_p3 = pnand %p763_p0, %p139_p2 }
   0x6   : > { %p169_p4 = scmp.lt.s32.totalorder (!%p140_p3), %s916_s9, 1  ;;  %v926_v0 = vmov (!%p140_p3), 0.0   ;;  %vm927_vm0 = vmmov (!%p140_p3), 0   ;;  %s928_s17 = smov (!%p140_p3), 96   ;;  %vm204_vm1 = vcmask (!%p140_p3), 64512   ;;  %v190_v5 = vlaneseq (!%p140_p3) }
   0x7   : > { %143 = sbr.rel (%p140_p3) target bundleno = 1605 (0x645), region = 28  ;;  %795 = vmatprep.subr.bf16.mxu0 (!%p140_p3), %v926_v0  ;;  %797 = vmatprep.mubr.msk.bf16.mxu0 (!%p140_p3), %vm927_vm0, %v926_v0  ;;  %s929_s21 = smov (!%p140_p3), 64   ;;  %v931_v9 = vmov (!%p140_p3), -1e+30   ;;  %vm270_vm3 = vcmask (!%p140_p3), 1043456   ;;  %vm666_vm4 = vcmask (!%p140_p3), 130048  }
   0x8   : > { %801 = vmatprep.subr.bf16.mxu1 (!%p140_p3), %v926_v0  ;;  %803 = vmatprep.mubr.msk.bf16.mxu1 (!%p140_p3), %vm927_vm0, %v926_v0  ;;  %s930_s22 = smov (!%p140_p3), 88   ;;  %v191_v6 = vshrl.u32 (!%p140_p3), %v190_v5, 7  ;;  %v196_v7 = vand.u32 (!%p140_p3), 127, %v190_v5  ;;  %s932_s23 = smov (!%p140_p3), 72   ;;  %vm668_vm5 = vcmask (!%p140_p3), 195584   ;;  %vm671_vm6 = vcmask (!%p140_p3), 257024  }
   0x9   : > { %s933_s24 = smov (!%p140_p3), 120   ;;  %s934_s25 = smov (!%p140_p3), 80  }
   0xa   : > { %vm197_vm2 = vcmp.le.s32.totalorder (!%p140_p3), %v196_v7, %v191_v6  ;;  %s935_s26 = smov (!%p140_p3), 112   ;;  %s936_s27 = smov (!%p140_p3), 104  }
   0xb   : > { %v1002_v10 = vsel (!%p140_p3), %vm197_vm2, 0.0, %v931_v9  ;;  %s937_s28 = smov (!%p140_p3), 56   ;;  %s938_s29 = smov (!%p140_p3), 48  }
   0xc   : > { %s939_s30 = smov (!%p140_p3), 40   ;;  %s940_s3 = smov (!%p140_p3), 8  }
   0xd   : > { %s941_s4 = smov (!%p140_p3), 16   ;;  %s942_s5 = smov (!%p140_p3), 24  }
   0xe   : > { %s1075_s9 = smov (!%p169_p4, %s916_s9), 1 }
   0xf   : > { %s982_s13 = sshll.u32 %s1075_s9, 2 }
  0x10   : > { %s179_s16 = scalar_lea.vmem %s1068_s1, %s982_s13  ;;  %s175_s20 = scalar_lea.vmem %s1067_s0, %s982_s13 }
  0x11   : > { %v988_v1 = vld [vmem:[%s179_s16] ss:$0 sps:$4 sm:$0xff]   ;;  %s186_s8 = scalar_lea.vmem %s1069_s2, %s982_s13 }
  0x12   : > { %202 = vrot.lane.b32.xlu0 %v988_v1, %s928_s17  ;;  %v188_v4 = vld [vmem:[%s175_s20] sm:$0xf]  ;;  %265 = vrot.lane.b32.xlu1 %v988_v1, %s929_s21 }
  0x13   : > { %v770_v24 = vcombine.low %v188_v4, %v188_v4 }
  0x16   : > { %319 = vrot.lane.b32.xlu1 %v988_v1, %s930_s22 }
  0x84   : > { %v203_v2 = vpop.permute.xlu0 %202  ;;  %v266_v17 = vpop.permute.xlu1 %265 }
  0x85   : > { %v209_v3 = vsel %vm204_vm1, %v203_v2, 0  ;;  %v272_v18 = vsel %vm270_vm3, %v266_v17, 0 }
  0x86   : > { %796 = vmatpush3.bf16.xpose.msra.mxu0 %v209_v3  ;;  %802 = vmatpush3.bf16.msra.mxu1 %v272_v18 }
  0x87   : > { %813 = vmatprep.subr.bf16.mxu0 %v926_v0  ;;  %807 = vmatprep.subr.bf16.mxu1 %v926_v0 }
  0x88   : > { %v320_v25 = vpop.permute.xlu1 %319 }
  0x89   : > { %v325_v31 = vsel %vm204_vm1, %v320_v25, 0 }
  0x8d   : > { %798 = vmatmul.mubr.msk.bf16.vlgmr.msra.gmra.mrb[0].mxu0 %vm204_vm1, %v188_v4 }
  0x8e   : > { %815 = vmatprep.mubr.msk.bf16.mxu0 %vm927_vm0, %v926_v0 }
 0x160   : > { %v245_v8 = vpop.f32.mrb[0].mxu0 }
 0x161   : > { %v251_v11 = vmul.f32 0.35355338, %v245_v8  ;;  %v799_v12 = vpop.f32.mrb[1].mxu0 }
 0x162   : > { %v248_v13 = vpop.f32.mrb[2].mxu0 }
 0x163   : > { %v800_v14 = vpop.f32.mrb[3].mxu0  ;;  %v252_v15 = vadd.f32 %v251_v11, %v1002_v10 }
 0x165   : > { %v253_v16 = vsel %vm204_vm1, %v252_v15, -inf }
 0x166   : > { %254 = vmax.xlane.f32.xlu0 %v253_v16 }
 0x17c   : > { %543 = vrot.lane.b32.xlu0 %v988_v1, %s932_s23 }
 0x1f3   : > { %v255_v19 = vpop.xlane.xlu0 %254 }
 0x1f4   : > { %v256_v20 = vsub.f32 %v252_v15, %v255_v19 }
 0x1f6   : > { %v257_v21 = vmul.f32 1.442695, %v256_v20 }
 0x1f7   : > { %v544_v34 = vpop.permute.xlu0 %543 }
 0x1f8   : > { %886 = vpow2.f32 %v257_v21  ;;  %v549_v36 = vsel %vm204_vm1, %v544_v34, 0 }
 0x202   : > { %v887_v22 = vpop.eup %886 }
 0x203   : > { %v259_v23 = vsel %vm204_vm1, %v887_v22, 0.0 }
 0x204   : > { %260 = vadd.xlane.f32.xlu1 %v259_v23 }
 0x215   : > { %317 = vrot.lane.b32.xlu1 %v770_v24, %s933_s24 }
 0x219   : > { %431 = vrot.lane.b32.xlu1 %v988_v1, %s934_s25 }
 0x21d   : > { %429 = vrot.lane.b32.xlu1 %v770_v24, %s935_s26 }
 0x221   : > { %541 = vrot.lane.b32.xlu1 %v770_v24, %s936_s27 }
 0x291   : > { %v261_v26 = vpop.xlane.xlu1 %260 }
 0x292   : > { %888 = vrcp.f32 %v261_v26 }
 0x295   : > { %v318_v29 = vpop.permute.xlu1 %317 }
 0x299   : > { %v432_v32 = vpop.permute.xlu1 %431 }
 0x29a   : > { %v437_v33 = vsel %vm204_vm1, %v432_v32, 0 }
 0x29c   : > { %v889_v27 = vpop.eup %888 }
 0x29d   : > { %v263_v28 = vmul.f32 %v889_v27, %v887_v22  ;;  %v430_v35 = vpop.permute.xlu1 %429 }
 0x29f   : > { %v264_v30 = vpack.c.bf16 %v263_v28, %v263_v28 }
 0x2a1   : > { %804 = vmatmul.mubr.msk.bf16.vlgmr.msra.gmra.mrb[0].mxu1 %vm204_vm1, %v264_v30  ;;  %v542_v37 = vpop.permute.xlu1 %541 }
 0x2a2   : > { %808 = vmatpush3.bf16.xpose.msra.mxu1 %v325_v31  ;;  %809 = vmatprep.mubr.msk.bf16.mxu1 %vm927_vm0, %v926_v0 }
 0x2a3   : > { %819 = vmatprep.subr.bf16.mxu1 %v926_v0 }
 0x2a9   : > { %810 = vmatmul.mubr.msk.bf16.vlgmr.msra.gmra.mrb[4].mxu1 %vm204_vm1, %v318_v29 }
 0x2aa   : > { %820 = vmatpush3.bf16.xpose.msra.mxu1 %v437_v33  ;;  %821 = vmatprep.mubr.msk.bf16.mxu1 %vm927_vm0, %v926_v0 }
 0x2ab   : > { %831 = vmatprep.subr.bf16.mxu1 %v926_v0 }
 0x2b1   : > { %822 = vmatmul.mubr.msk.bf16.vlgmr.msra.gmra.mrb[8].mxu1 %vm204_vm1, %v430_v35 }
 0x2b2   : > { %832 = vmatpush3.bf16.xpose.msra.mxu1 %v549_v36  ;;  %833 = vmatprep.mubr.msk.bf16.mxu1 %vm927_vm0, %v926_v0 }
 0x2b9   : > { %834 = vmatmul.mubr.msk.bf16.vlgmr.msra.gmra.mrb[12].mxu1 %vm204_vm1, %v542_v37 }
 0x374   : > { %v1026_v38 = vpop.f32.mrb[0].mxu1 }
 0x375   : > { %v805_v39 = vpop.f32.mrb[1].mxu1 }
 0x376   : > { %v311_v40 = vpop.f32.mrb[2].mxu1 }
 0x377   : > { %v806_v41 = vpop.f32.mrb[3].mxu1 }
 0x37c   : > { %v361_v42 = vpop.f32.mrb[4].mxu1 }
 0x37d   : > { %v367_v43 = vmul.f32 0.35355338, %v361_v42  ;;  %v811_v44 = vpop.f32.mrb[5].mxu1 }
 0x37e   : > { %v364_v45 = vpop.f32.mrb[6].mxu1 }
 0x37f   : > { %v812_v46 = vpop.f32.mrb[7].mxu1  ;;  %v368_v47 = vadd.f32 %v367_v43, %v1002_v10 }
 0x381   : > { %v369_v48 = vsel %vm204_vm1, %v368_v47, -inf }
 0x382   : > { %370 = vmax.xlane.f32.xlu1 %v369_v48 }
 0x384   : > { %v473_v49 = vpop.f32.mrb[8].mxu1 }
 0x385   : > { %v479_v50 = vmul.f32 0.35355338, %v473_v49  ;;  %v823_v51 = vpop.f32.mrb[9].mxu1 }
 0x386   : > { %v476_v52 = vpop.f32.mrb[10].mxu1 }
 0x387   : > { %v480_v53 = vadd.f32 %v479_v50, %v1002_v10  ;;  %v824_v54 = vpop.f32.mrb[11].mxu1 }
 0x389   : > { %v481_v55 = vsel %vm204_vm1, %v480_v53, -inf }
 0x38a   : > { %482 = vmax.xlane.f32.xlu0 %v481_v55 }
 0x38c   : > { %v585_v56 = vpop.f32.mrb[12].mxu1 }
 0x38d   : > { %v591_v57 = vmul.f32 0.35355338, %v585_v56  ;;  %v835_v58 = vpop.f32.mrb[13].mxu1 }
 0x38e   : > { %v588_v59 = vpop.f32.mrb[14].mxu1 }
 0x38f   : > { %v592_v60 = vadd.f32 %v591_v57, %v1002_v10  ;;  %v836_v61 = vpop.f32.mrb[15].mxu1 }
 0x391   : > { %v593_v62 = vsel %vm204_vm1, %v592_v60, -inf }
 0x392   : > { %594 = vmax.xlane.f32.xlu1 %v593_v62 }
 0x40f   : > { %v371_v63 = vpop.xlane.xlu1 %370 }
 0x410   : > { %v372_v2 = vsub.f32 %v368_v47, %v371_v63 }
 0x412   : > { %v373_v3 = vmul.f32 1.442695, %v372_v2 }
 0x414   : > { %890 = vpow2.f32 %v373_v3 }
 0x417   : > { %v483_v10 = vpop.xlane.xlu0 %482 }
 0x418   : > { %v484_v12 = vsub.f32 %v480_v53, %v483_v10 }
 0x41a   : > { %v485_v13 = vmul.f32 1.442695, %v484_v12 }
 0x41e   : > { %v891_v4 = vpop.eup %890 }
 0x41f   : > { %v595_v5 = vpop.xlane.xlu1 %594  ;;  %v375_v6 = vsel %vm204_vm1, %v891_v4, 0.0 }
 0x420   : > { %v596_v7 = vsub.f32 %v592_v60, %v595_v5  ;;  %376 = vadd.xlane.f32.xlu1 %v375_v6 }
 0x422   : > { %v597_v8 = vmul.f32 1.442695, %v596_v7 }
 0x424   : > { %892 = vpow2.f32 %v597_v8 }
 0x425   : > { %894 = vpow2.f32 %v485_v13 }
 0x42e   : > { %v893_v9 = vpop.eup %892 }
 0x42f   : > { %v599_v11 = vsel %vm204_vm1, %v893_v9, 0.0  ;;  %v895_v14 = vpop.eup %894 }
 0x430   : > { %600 = vadd.xlane.f32.xlu0 %v599_v11  ;;  %v487_v15 = vsel %vm204_vm1, %v895_v14, 0.0 }
 0x431   : > { %381 = vrot.lane.b32.xlu1 %v988_v1, %s937_s28 }
 0x446   : > { %493 = vrot.lane.b32.xlu0 %v988_v1, %s938_s29 }
 0x455   : > { %488 = vadd.xlane.f32.xlu1 %v487_v15 }
 0x466   : > { %605 = vrot.lane.b32.xlu1 %v988_v1, %s939_s30 }
 0x4ad   : > { %v377_v16 = vpop.xlane.xlu1 %376 }
 0x4ae   : > { %896 = vrcp.f32 %v377_v16 }
 0x4b1   : > { %v382_v17 = vpop.permute.xlu1 %381 }
 0x4b2   : > { %v387_v18 = vsel %vm270_vm3, %v382_v17, 0 }
 0x4b3   : > { %814 = vmatpush3.bf16.msra.mxu0 %v387_v18 }
 0x4b4   : > { %825 = vmatprep.subr.bf16.mxu0 %v926_v0 }
 0x4b8   : > { %v897_v19 = vpop.eup %896 }
 0x4b9   : > { %v379_v20 = vmul.f32 %v897_v19, %v891_v4 }
 0x4bb   : > { %v380_v21 = vpack.c.bf16 %v379_v20, %v379_v20 }
 0x4bd   : > { %816 = vmatmul.mubr.msk.bf16.vlgmr.msra.gmra.mrb[4].mxu0 %vm204_vm1, %v380_v21  ;;  %v601_v22 = vpop.xlane.xlu0 %600 }
 0x4be   : > { %827 = vmatprep.mubr.msk.bf16.mxu0 %vm927_vm0, %v926_v0 }
 0x4c1   : > { %v494_v23 = vpop.permute.xlu0 %493 }
 0x4c2   : > { %v499_v1 = vsel %vm270_vm3, %v494_v23, 0 }
 0x4c3   : > { %826 = vmatpush3.bf16.msra.mxu0 %v499_v1 }
 0x4c4   : > { %837 = vmatprep.subr.bf16.mxu0 %v926_v0 }
 0x4e2   : > { %v489_v24 = vpop.xlane.xlu1 %488 }
 0x4e3   : > { %898 = vrcp.f32 %v489_v24 }
 0x4e4   : > { %900 = vrcp.f32 %v601_v22 }
 0x4e6   : > { %v606_v26 = vpop.permute.xlu1 %605 }
 0x4e7   : > { %v611_v28 = vsel %vm270_vm3, %v606_v26, 0 }
 0x4ed   : > { %v899_v25 = vpop.eup %898 }
 0x4ee   : > { %v491_v27 = vmul.f32 %v899_v25, %v895_v14  ;;  %v901_v30 = vpop.eup %900 }
 0x4ef   : > { %v603_v31 = vmul.f32 %v901_v30, %v893_v9 }
 0x4f0   : > { %v492_v29 = vpack.c.bf16 %v491_v27, %v491_v27 }
 0x4f1   : > { %v604_v32 = vpack.c.bf16 %v603_v31, %v603_v31 }
 0x4f2   : > { %828 = vmatmul.mubr.msk.bf16.vlgmr.msra.gmra.mrb[8].mxu0 %vm204_vm1, %v492_v29 }
 0x4f3   : > { %838 = vmatpush3.bf16.msra.mxu0 %v611_v28  ;;  %839 = vmatprep.mubr.msk.bf16.mxu0 %vm927_vm0, %v926_v0 }
 0x4fa   : > { %840 = vmatmul.mubr.msk.bf16.vlgmr.msra.gmra.mrb[12].mxu0 %vm204_vm1, %v604_v32 }
 0x590   : > { %v423_v33 = vpop.f32.mrb[4].mxu0 }
 0x591   : > { %654 = vrot.lane.b32.xlu1 %v423_v33, %s940_s3  ;;  %v817_v34 = vpop.f32.mrb[5].mxu0 }
 0x592   : > { %v426_v35 = vpop.f32.mrb[6].mxu0 }
 0x593   : > { %v818_v36 = vpop.f32.mrb[7].mxu0 }
 0x5c5   : > { %v535_v37 = vpop.f32.mrb[8].mxu0 }
 0x5c6   : > { %658 = vrot.lane.b32.xlu0 %v535_v37, %s941_s4  ;;  %v829_v39 = vpop.f32.mrb[9].mxu0 }
 0x5c7   : > { %v538_v40 = vpop.f32.mrb[10].mxu0 }
 0x5c8   : > { %v830_v41 = vpop.f32.mrb[11].mxu0 }
 0x5cd   : > { %v647_v42 = vpop.f32.mrb[12].mxu0 }
 0x5ce   : > { %662 = vrot.lane.b32.xlu1 %v647_v42, %s942_s5  ;;  %v841_v0 = vpop.f32.mrb[13].mxu0 }
 0x5cf   : > { %v650_v43 = vpop.f32.mrb[14].mxu0 }
 0x5d0   : > { %v842_v44 = vpop.f32.mrb[15].mxu0 }
 0x603   : > { %v655_v45 = vpop.permute.xlu1 %654 }
 0x604   : > { %v665_v47 = vsel %vm204_vm1, %v1026_v38, %v655_v45 }
 0x638   : > { %v659_v46 = vpop.permute.xlu0 %658 }
 0x639   : > { %v667_v48 = vsel %vm666_vm4, %v665_v47, %v659_v46 }
 0x640   : > { %v663_v49 = vpop.permute.xlu1 %662 }
 0x641   : > { %v669_v50 = vsel %vm668_vm5, %v667_v48, %v663_v49 }
 0x642   : > { %v670_v51 = vpack.c.bf16 %v669_v50, %v669_v50 }
 0x644   : > { %672 = vst.msk [vmem:[%s186_s8] sm:$0xf] %vm671_vm6, %v670_v51 }
 0x645 PF: > { %s12_s11 = sadd.s32 1, %s924_s11   ;;  %s1070_s9 = smov %s920_s10 }
 0x646   : > { %p9_p5 = scmp.ge.s32.totalorder %s12_s11, 4   ;;  %s1071_s10 = smov %s1073_s12 }
 0x648   :  { %11 = sbr.rel (!%p9_p5) target bundleno = 2 (0x2), region = 61 }

// kernel: transformer_forward.39
= control target key start
LH: loop header
LB: loop body
LE: loop exit
PB: predicated region body
PF: predicated region fallthrough
CT: control target
= control target key end

     0   :  { %s933_s9 = smov 0   ;;  %s935_s10 = smov 0   ;;  %s1035_s0 = inlined_call_operand.vmem [shape: bf16[2,8,32], index: 0, kind: input, shape index: {}]   ;;  %s1036_s1 = inlined_call_operand.vmem [shape: bf16[2,8,64], index: 1, kind: input, shape index: {}]   ;;  %s1037_s2 = inlined_call_operand.vmem [shape: bf16[2,8,32], index: 2, kind: output, shape index: {}]  }
   0x1   :  { %s937_s11 = smov 0  }
   0x2 LB: > { %s24_s12 = sadd.s32 1, %s900_s10  ;;  %p748_p0 = scmp.ge.s32.totalorder %s904_s11, 1  ;;  %s904_s11 = sphi %s937_s11, %s12_s11   ;;  %s900_s10 = sphi %s935_s10, %s1039_s10   ;;  %s896_s9 = sphi %s933_s9, %s1038_s9  }
   0x3   : > { %p26_p1 = scmp.ge.s32.totalorder %s24_s12, 2  ;;  %p139_p2 = scmp.lt.s32.totalorder %s904_s11, 3 }
   0x5   : > { %s1041_s12 = smov (%p26_p1, %s24_s12), 0  ;;  %p140_p3 = pnand %p748_p0, %p139_p2 }
   0x6   : > { %p169_p4 = scmp.lt.s32.totalorder (!%p140_p3), %s896_s9, 1  ;;  %v906_v0 = vmov (!%p140_p3), 0.0   ;;  %vm907_vm0 = vmmov (!%p140_p3), 0   ;;  %vm190_vm1 = vcmask (!%p140_p3), 64512   ;;  %s908_s20 = smov (!%p140_p3), 96   ;;  %vm258_vm2 = vcmask (!%p140_p3), 1043456  }
   0x7   : > { %143 = sbr.rel (%p140_p3) target bundleno = 1442 (0x5a2), region = 28  ;;  %780 = vmatprep.subr.bf16.mxu0 (!%p140_p3), %v906_v0  ;;  %782 = vmatprep.mubr.msk.bf16.mxu0 (!%p140_p3), %vm907_vm0, %v906_v0  ;;  %s909_s21 = smov (!%p140_p3), 120   ;;  %vm651_vm3 = vcmask (!%p140_p3), 130048   ;;  %vm653_vm4 = vcmask (!%p140_p3), 195584   ;;  %vm656_vm5 = vcmask (!%p140_p3), 257024  }
   0x8   : > { %786 = vmatprep.subr.bf16.mxu1 (!%p140_p3), %v906_v0  ;;  %788 = vmatprep.mubr.msk.bf16.mxu1 (!%p140_p3), %vm907_vm0, %v906_v0  ;;  %s910_s22 = smov (!%p140_p3), 112   ;;  %s911_s23 = smov (!%p140_p3), 104  }
   0x9   : > { %s912_s24 = smov (!%p140_p3), 88   ;;  %s913_s25 = smov (!%p140_p3), 72  }
   0xa   : > { %s914_s26 = smov (!%p140_p3), 80   ;;  %s915_s27 = smov (!%p140_p3), 8  }
   0xb   : > { %s916_s28 = smov (!%p140_p3), 16   ;;  %s917_s29 = smov (!%p140_p3), 24  }
   0xe   : > { %s1043_s9 = smov (!%p169_p4, %s896_s9), 1 }
   0xf   : > { %s957_s13 = sshll.u32 %s1043_s9, 2 }
  0x10   : > { %s179_s16 = scalar_lea.vmem %s1036_s1, %s957_s13  ;;  %s175_s19 = scalar_lea.vmem %s1035_s0, %s957_s13 }
  0x11   : > { %v189_v1 = vld [vmem:[%s179_s16] sm:$0xf]  ;;  %s186_s4 = scalar_lea.vmem %s1037_s2, %s957_s13 }
  0x12   : > { %v195_v2 = vsel %vm190_vm1, %v189_v1, 0  ;;  %v188_v3 = vld [vmem:[%s175_s19] sm:$0xf]  ;;  %v973_v10 = vcombine.low %v189_v1, %v189_v1 }
  0x13   : > { %781 = vmatpush3.bf16.xpose.msra.mxu0 %v195_v2  ;;  %v755_v11 = vcombine.low %v188_v3, %v188_v3 }
  0x14   : > { %798 = vmatprep.subr.bf16.mxu0 %v906_v0  ;;  %253 = vrot.lane.b32.xlu1 %v973_v10, %s908_s20 }
  0x18   : > { %307 = vrot.lane.b32.xlu1 %v973_v10, %s909_s21 }
  0x1a   : > { %783 = vmatmul.mubr.msk.bf16.vlgmr.msra.gmra.mrb[0].mxu0 %vm190_vm1, %v188_v3 }
  0x1b   : > { %800 = vmatprep.mubr.msk.bf16.mxu0 %vm907_vm0, %v906_v0 }
  0x1c   : > { %418 = vrot.lane.b32.xlu1 %v973_v10, %s910_s22 }
  0x20   : > { %416 = vrot.lane.b32.xlu1 %v755_v11, %s910_s22 }
  0x24   : > { %529 = vrot.lane.b32.xlu1 %v973_v10, %s911_s23 }
  0x28   : > { %527 = vrot.lane.b32.xlu1 %v755_v11, %s911_s23 }
  0x86   : > { %v254_v17 = vpop.permute.xlu1 %253 }
  0x87   : > { %v260_v18 = vsel %vm258_vm2, %v254_v17, 0 }
  0x88   : > { %787 = vmatpush3.bf16.msra.mxu1 %v260_v18 }
  0x89   : > { %792 = vmatprep.subr.bf16.mxu1 %v906_v0 }
  0x8a   : > { %v308_v21 = vpop.permute.xlu1 %307 }
  0x8b   : > { %v313_v23 = vsel %vm190_vm1, %v308_v21, 0 }
  0x8e   : > { %v419_v25 = vpop.permute.xlu1 %418 }
  0x8f   : > { %v424_v28 = vsel %vm190_vm1, %v419_v25, 0 }
  0x92   : > { %v417_v27 = vpop.permute.xlu1 %416 }
  0x96   : > { %v530_v29 = vpop.permute.xlu1 %529 }
  0x97   : > { %v535_v30 = vsel %vm190_vm1, %v530_v29, 0 }
  0x9a   : > { %v528_v31 = vpop.permute.xlu1 %527 }
  0xed   : > { %v231_v4 = vpop.f32.mrb[0].mxu0 }
  0xee   : > { %v237_v5 = vmul.f32 0.35355338, %v231_v4  ;;  %v784_v6 = vpop.f32.mrb[1].mxu0 }
  0xef   : > { %v234_v7 = vpop.f32.mrb[2].mxu0 }
  0xf0   : > { %v785_v8 = vpop.f32.mrb[3].mxu0  ;;  %v238_v9 = vsel %vm190_vm1, %v237_v5, -inf }
  0xf1   : > { %239 = vmax.xlane.f32.xlu0 %v238_v9 }
 0x17e   : > { %v240_v12 = vpop.xlane.xlu0 %239 }
 0x17f   : > { %v241_v13 = vsub.f32 %v237_v5, %v240_v12 }
 0x181   : > { %v242_v14 = vmul.f32 1.442695, %v241_v13 }
 0x183   : > { %866 = vpow2.f32 %v242_v14 }
 0x18d   : > { %v867_v15 = vpop.eup %866 }
 0x18e   : > { %v244_v16 = vsel %vm190_vm1, %v867_v15, 0.0 }
 0x18f   : > { %245 = vadd.xlane.f32.xlu0 %v244_v16 }
 0x1a5   : > { %305 = vrot.lane.b32.xlu0 %v755_v11, %s909_s21 }
 0x21c   : > { %v246_v19 = vpop.xlane.xlu0 %245 }
 0x21d   : > { %868 = vrcp.f32 %v246_v19 }
 0x220   : > { %v306_v26 = vpop.permute.xlu0 %305 }
 0x227   : > { %v869_v20 = vpop.eup %868 }
 0x228   : > { %v248_v22 = vmul.f32 %v869_v20, %v867_v15 }
 0x22a   : > { %v249_v24 = vpack.c.bf16 %v248_v22, %v248_v22 }
 0x22c   : > { %789 = vmatmul.mubr.msk.bf16.vlgmr.msra.gmra.mrb[0].mxu1 %vm190_vm1, %v249_v24 }
 0x22d   : > { %793 = vmatpush3.bf16.xpose.msra.mxu1 %v313_v23  ;;  %794 = vmatprep.mubr.msk.bf16.mxu1 %vm907_vm0, %v906_v0 }
 0x22e   : > { %804 = vmatprep.subr.bf16.mxu1 %v906_v0 }
 0x234   : > { %795 = vmatmul.mubr.msk.bf16.vlgmr.msra.gmra.mrb[4].mxu1 %vm190_vm1, %v306_v26 }
 0x235   : > { %805 = vmatpush3.bf16.xpose.msra.mxu1 %v424_v28  ;;  %806 = vmatprep.mubr.msk.bf16.mxu1 %vm907_vm0, %v906_v0 }
 0x236   : > { %816 = vmatprep.subr.bf16.mxu1 %v906_v0 }
 0x23c   : > { %807 = vmatmul.mubr.msk.bf16.vlgmr.msra.gmra.mrb[8].mxu1 %vm190_vm1, %v417_v27 }
 0x23d   : > { %817 = vmatpush3.bf16.xpose.msra.mxu1 %v535_v30  ;;  %818 = vmatprep.mubr.msk.bf16.mxu1 %vm907_vm0, %v906_v0 }
 0x244   : > { %819 = vmatmul.mubr.msk.bf16.vlgmr.msra.gmra.mrb[12].mxu1 %vm190_vm1, %v528_v31 }
 0x2ff   : > { %v997_v32 = vpop.f32.mrb[0].mxu1 }
 0x300   : > { %v790_v33 = vpop.f32.mrb[1].mxu1 }
 0x301   : > { %v299_v34 = vpop.f32.mrb[2].mxu1 }
 0x302   : > { %v791_v35 = vpop.f32.mrb[3].mxu1 }
 0x307   : > { %v349_v36 = vpop.f32.mrb[4].mxu1 }
 0x308   : > { %v355_v37 = vmul.f32 0.35355338, %v349_v36  ;;  %v796_v38 = vpop.f32.mrb[5].mxu1 }
 0x309   : > { %v352_v39 = vpop.f32.mrb[6].mxu1 }
 0x30a   : > { %v797_v40 = vpop.f32.mrb[7].mxu1  ;;  %v356_v41 = vsel %vm190_vm1, %v355_v37, -inf }
 0x30b   : > { %357 = vmax.xlane.f32.xlu1 %v356_v41 }
 0x30f   : > { %v460_v42 = vpop.f32.mrb[8].mxu1 }
 0x310   : > { %v466_v43 = vmul.f32 0.35355338, %v460_v42  ;;  %v808_v44 = vpop.f32.mrb[9].mxu1 }
 0x311   : > { %v463_v45 = vpop.f32.mrb[10].mxu1 }
 0x312   : > { %v809_v46 = vpop.f32.mrb[11].mxu1  ;;  %v467_v47 = vsel %vm190_vm1, %v466_v43, -inf }
 0x313   : > { %468 = vmax.xlane.f32.xlu0 %v467_v47 }
 0x317   : > { %v571_v48 = vpop.f32.mrb[12].mxu1 }
 0x318   : > { %v577_v49 = vmul.f32 0.35355338, %v571_v48  ;;  %v820_v50 = vpop.f32.mrb[13].mxu1 }
 0x319   : > { %v574_v51 = vpop.f32.mrb[14].mxu1 }
 0x31a   : > { %v821_v52 = vpop.f32.mrb[15].mxu1  ;;  %v578_v53 = vsel %vm190_vm1, %v577_v49, -inf }
 0x31b   : > { %579 = vmax.xlane.f32.xlu1 %v578_v53 }
 0x32c   : > { %368 = vrot.lane.b32.xlu1 %v973_v10, %s912_s24 }
 0x398   : > { %v358_v54 = vpop.xlane.xlu1 %357 }
 0x399   : > { %v359_v55 = vsub.f32 %v355_v37, %v358_v54 }
 0x39b   : > { %v360_v56 = vmul.f32 1.442695, %v359_v55 }
 0x39d   : > { %870 = vpow2.f32 %v360_v56 }
 0x3a0   : > { %v469_v57 = vpop.xlane.xlu0 %468 }
 0x3a1   : > { %v470_v58 = vsub.f32 %v466_v43, %v469_v57 }
 0x3a3   : > { %v471_v59 = vmul.f32 1.442695, %v470_v58 }
 0x3a5   : > { %872 = vpow2.f32 %v471_v59 }
 0x3a7   : > { %v871_v60 = vpop.eup %870 }
 0x3a8   : > { %v580_v61 = vpop.xlane.xlu1 %579  ;;  %v362_v62 = vsel %vm190_vm1, %v871_v60, 0.0 }
 0x3a9   : > { %v581_v63 = vsub.f32 %v577_v49, %v580_v61  ;;  %363 = vadd.xlane.f32.xlu0 %v362_v62 }
 0x3ab   : > { %v582_v1 = vmul.f32 1.442695, %v581_v63 }
 0x3ac   : > { %v369_v2 = vpop.permute.xlu1 %368 }
 0x3ad   : > { %874 = vpow2.f32 %v582_v1  ;;  %v374_v3 = vsel %vm258_vm2, %v369_v2, 0 }
 0x3ae   : > { %799 = vmatpush3.bf16.msra.mxu0 %v374_v3 }
 0x3af   : > { %v873_v4 = vpop.eup %872  ;;  %810 = vmatprep.subr.bf16.mxu0 %v906_v0 }
 0x3b0   : > { %v473_v5 = vsel %vm190_vm1, %v873_v4, 0.0 }
 0x3b1   : > { %474 = vadd.xlane.f32.xlu1 %v473_v5 }
 0x3b7   : > { %v875_v6 = vpop.eup %874 }
 0x3b8   : > { %v584_v7 = vsel %vm190_vm1, %v875_v6, 0.0 }
 0x3b9   : > { %585 = vadd.xlane.f32.xlu0 %v584_v7 }
 0x3c2   : > { %590 = vrot.lane.b32.xlu1 %v973_v10, %s913_s25 }
 0x3cf   : > { %479 = vrot.lane.b32.xlu0 %v973_v10, %s914_s26 }
 0x436   : > { %v364_v8 = vpop.xlane.xlu0 %363 }
 0x437   : > { %876 = vrcp.f32 %v364_v8 }
 0x43e   : > { %v475_v9 = vpop.xlane.xlu1 %474 }
 0x43f   : > { %878 = vrcp.f32 %v475_v9 }
 0x441   : > { %v877_v11 = vpop.eup %876 }
 0x442   : > { %v366_v12 = vmul.f32 %v877_v11, %v871_v60  ;;  %v591_v18 = vpop.permute.xlu1 %590 }
 0x443   : > { %v596_v20 = vsel %vm258_vm2, %v591_v18, 0 }
 0x444   : > { %v367_v13 = vpack.c.bf16 %v366_v12, %v366_v12 }
 0x446   : > { %v586_v14 = vpop.xlane.xlu0 %585  ;;  %801 = vmatmul.mubr.msk.bf16.vlgmr.msra.gmra.mrb[4].mxu0 %vm190_vm1, %v367_v13 }
 0x447   : > { %880 = vrcp.f32 %v586_v14  ;;  %812 = vmatprep.mubr.msk.bf16.mxu0 %vm907_vm0, %v906_v0 }
 0x449   : > { %v879_v15 = vpop.eup %878 }
 0x44a   : > { %v477_v16 = vmul.f32 %v879_v15, %v873_v4  ;;  %v480_v17 = vpop.permute.xlu0 %479 }
 0x44b   : > { %v485_v10 = vsel %vm258_vm2, %v480_v17, 0 }
 0x44c   : > { %811 = vmatpush3.bf16.msra.mxu0 %v485_v10  ;;  %v478_v19 = vpack.c.bf16 %v477_v16, %v477_v16 }
 0x44d   : > { %822 = vmatprep.subr.bf16.mxu0 %v906_v0 }
 0x44f   : > { %813 = vmatmul.mubr.msk.bf16.vlgmr.msra.gmra.mrb[8].mxu0 %vm190_vm1, %v478_v19 }
 0x450   : > { %823 = vmatpush3.bf16.msra.mxu0 %v596_v20  ;;  %824 = vmatprep.mubr.msk.bf16.mxu0 %vm907_vm0, %v906_v0 }
 0x451   : > { %v881_v21 = vpop.eup %880 }
 0x452   : > { %v588_v22 = vmul.f32 %v881_v21, %v875_v6 }
 0x454   : > { %v589_v23 = vpack.c.bf16 %v588_v22, %v588_v22 }
 0x457   : > { %825 = vmatmul.mubr.msk.bf16.vlgmr.msra.gmra.mrb[12].mxu0 %vm190_vm1, %v589_v23 }
 0x519   : > { %v410_v24 = vpop.f32.mrb[4].mxu0 }
 0x51a   : > { %639 = vrot.lane.b32.xlu1 %v410_v24, %s915_s27  ;;  %v802_v25 = vpop.f32.mrb[5].mxu0 }
 0x51b   : > { %v413_v26 = vpop.f32.mrb[6].mxu0 }
 0x51c   : > { %v803_v27 = vpop.f32.mrb[7].mxu0 }
 0x522   : > { %v521_v28 = vpop.f32.mrb[8].mxu0 }
 0x523   : > { %643 = vrot.lane.b32.xlu0 %v521_v28, %s916_s28  ;;  %v814_v29 = vpop.f32.mrb[9].mxu0 }
 0x524   : > { %v524_v30 = vpop.f32.mrb[10].mxu0 }
 0x525   : > { %v815_v31 = vpop.f32.mrb[11].mxu0 }
 0x52a   : > { %v632_v33 = vpop.f32.mrb[12].mxu0 }
 0x52b   : > { %647 = vrot.lane.b32.xlu1 %v632_v33, %s917_s29  ;;  %v826_v0 = vpop.f32.mrb[13].mxu0 }
 0x52c   : > { %v635_v34 = vpop.f32.mrb[14].mxu0 }
 0x52d   : > { %v827_v35 = vpop.f32.mrb[15].mxu0 }
 0x58c   : > { %v640_v36 = vpop.permute.xlu1 %639 }
 0x58d   : > { %v650_v38 = vsel %vm190_vm1, %v997_v32, %v640_v36 }
 0x595   : > { %v644_v37 = vpop.permute.xlu0 %643 }
 0x596   : > { %v652_v39 = vsel %vm651_vm3, %v650_v38, %v644_v37 }
 0x59d   : > { %v648_v40 = vpop.permute.xlu1 %647 }
 0x59e   : > { %v654_v41 = vsel %vm653_vm4, %v652_v39, %v648_v40 }
 0x59f   : > { %v655_v42 = vpack.c.bf16 %v654_v41, %v654_v41 }
 0x5a1   : > { %657 = vst.msk [vmem:[%s186_s4] sm:$0xf] %vm656_vm5, %v655_v42 }
 0x5a2 PF: > { %s12_s11 = sadd.s32 1, %s904_s11   ;;  %s1038_s9 = smov %s900_s10 }
 0x5a3   : > { %p9_p5 = scmp.ge.s32.totalorder %s12_s11, 4   ;;  %s1039_s10 = smov %s1041_s12 }
 0x5a5   :  { %11 = sbr.rel (!%p9_p5) target bundleno = 2 (0x2), region = 61 }

</bundles_post_ra>
